<compile_context>
chip_gen: v7x
topology: tpu7x:2x2x1
jax: 0.10.0
libtpu: 0.0.40
codegen_flags: <defaults>
</compile_context>

<pallas_src>
import math

import numpy as np
import jax
import jax.numpy as jnp
from jax.experimental import pallas as pl
from jax.experimental.pallas import tpu as pltpu


def _round_up(a: int, b: int) -> int:
    return ((a + b - 1) // b) * b


def _harmonic_kernel(x_ref, w_ref, sin_ref, cos_ref):
    # x_ref : (TM, R*C)      packed super-rows of the input
    # w_ref : (R*C, R*C*H)   block-diagonal frequency-expansion matrix
    # embed[m, r*C*H + c*H + f] = x[m*R + r, c] * freq[f]   (lane-dense: R*C*H % 128 == 0)
    embed = jnp.dot(x_ref[...], w_ref[...],
                    preferred_element_type=jnp.float32)     # (TM, R*C*H)
    sin_ref[...] = jnp.sin(embed)                            # whole, unmasked stores
    cos_ref[...] = jnp.cos(embed)


def harmonic_embedding(x,
                       n_harmonic_functions: int = 6,
                       omega0: float = 1.0,
                       logspace: bool = True,
                       include_input: bool = True,
                       rows_per_block: int = 16384):
    """Pallas implementation of HarmonicEmbedding.forward (feature-last layout)."""
    x = jnp.asarray(x, jnp.float32)
    C = x.shape[-1]
    H = n_harmonic_functions
    CH = C * H
    D_out = 2 * CH + (C if include_input else 0)

    lead = x.shape[:-1]
    N = int(np.prod(lead)) if lead else 1
    if N == 0:                                   # empty batch: no pallas_call with grid=(0,)
        return jnp.zeros((*lead, D_out), jnp.float32)

    # --- deterministic "buffer" init, matching the module's __init__ ---
    if logspace:
        freqs = 2.0 ** jnp.arange(H, dtype=jnp.float32)
    else:
        freqs = jnp.linspace(1.0, 2.0 ** (H - 1), H, dtype=jnp.float32)
    freqs = omega0 * freqs                                            # (H,)

    # --- lane-dense row packing ---------------------------------------------
    # Pack R rows per super-row so the sin/cos operand width R*C*H is a
    # multiple of 128 lanes (for C=3, H=6: R=64, width 1152 = 9*128).
    R = 128 // math.gcd(CH, 128)
    RC, RCH = R * C, R * CH

    # Per-row expansion  W_small[c, c*H + f] = freq[f]; block-diagonal over R rows.
    W_small = (jnp.eye(C, dtype=jnp.float32)[:, :, None]
               * freqs[None, None, :]).reshape(C, CH)                 # (C, C*H)
    W = jnp.kron(jnp.eye(R, dtype=jnp.float32), W_small)              # (R*C, R*C*H)

    x_flat = x.reshape(N, C)
    M = pl.cdiv(N, R)                                                 # super-rows

    # Super-row tile: large (amortize ~0.35us/step pipeline overhead), multiple
    # of 8 sublanes, and capped so the parallel grid keeps >=2 blocks (v7x TCs).
    tm = max(1, rows_per_block // R)
    if M >= 16:
        tm = min(tm, pl.cdiv(M, 2))
    else:
        tm = M
    tm = max(8, _round_up(tm, 8))

    n_blocks = pl.cdiv(M, tm)
    M_pad = n_blocks * tm
    N_pad = M_pad * R
    x_flat_p = x_flat if N_pad == N else jnp.pad(x_flat, ((0, N_pad - N), (0, 0)))
    x_packed = x_flat_p.reshape(M_pad, RC)                            # (M_pad, R*C)

    sin_out, cos_out = pl.pallas_call(
        _harmonic_kernel,
        out_shape=(jax.ShapeDtypeStruct((M_pad, RCH), jnp.float32),
                   jax.ShapeDtypeStruct((M_pad, RCH), jnp.float32)),
        grid_spec=pltpu.PrefetchScalarGridSpec(
            num_scalar_prefetch=0,
            grid=(n_blocks,),
            in_specs=[
                pl.BlockSpec((tm, RC), lambda i: (i, 0)),   # packed input rows
                pl.BlockSpec((RC, RCH), lambda i: (0, 0)),  # full W, resident
            ],
            out_specs=[
                pl.BlockSpec((tm, RCH), lambda i: (i, 0)),  # sin (lane-dense)
                pl.BlockSpec((tm, RCH), lambda i: (i, 0)),  # cos (lane-dense)
            ],
        ),
        compiler_params=pltpu.CompilerParams(
            dimension_semantics=("parallel",)),
    )(x_packed, W)

    # Packed -> per-row layout is a pure reshape (c-major, f-minor matches ref).
    sin_rows = sin_out.reshape(M_pad * R, CH)[:N]
    cos_rows = cos_out.reshape(M_pad * R, CH)[:N]
    parts = [sin_rows, cos_rows]
    if include_input:
        parts.append(x_flat)
    # TODO(synk): when this embedding feeds an MLP (typical NeRF usage), fuse the
    # first linear layer into the kernel so the 39-wide concat never hits HBM.
    out = jnp.concatenate(parts, axis=-1)
    return out.reshape(*lead, D_out)


def _reference(x, n_harmonic_functions=6, omega0=1.0, logspace=True,
               include_input=True):
    x = jnp.asarray(x, jnp.float32)
    H = n_harmonic_functions
    if logspace:
        freqs = 2.0 ** jnp.arange(H, dtype=jnp.float32)
    else:
        freqs = jnp.linspace(1.0, 2.0 ** (H - 1), H, dtype=jnp.float32)
    freqs = omega0 * freqs
    embed = (x[..., None] * freqs).reshape(*x.shape[:-1], -1)
    parts = [jnp.sin(embed), jnp.cos(embed)]
    if include_input:
        parts.append(x)
    return jnp.concatenate(parts, axis=-1)


if __name__ == "__main__":
    key = jax.random.PRNGKey(0)

    # small ray-points-like input: batch=2, 16 points, in_channels=3
    x_small = jax.random.normal(key, (2, 16, 3), dtype=jnp.float32)
    out = jax.block_until_ready(harmonic_embedding(x_small))
    ref = _reference(x_small)
    assert out.shape == (2, 16, 6 * 2 * 3 + 3), out.shape
    np.testing.assert_allclose(np.asarray(out), np.asarray(ref),
                               rtol=1e-5, atol=1e-5)

    # larger input to exercise a multi-block (>=2) parallel grid
    x_big = jax.random.normal(jax.random.PRNGKey(1), (2, 2048, 3),
                              dtype=jnp.float32)
    out_b = jax.block_until_ready(harmonic_embedding(x_big))
    np.testing.assert_allclose(np.asarray(out_b), np.asarray(_reference(x_big)),
                               rtol=1e-5, atol=1e-5)

    # include_input=False branch
    out_c = jax.block_until_ready(harmonic_embedding(x_small, include_input=False))
    np.testing.assert_allclose(
        np.asarray(out_c), np.asarray(_reference(x_small, include_input=False)),
        rtol=1e-5, atol=1e-5)

    print("KERNEL_OK")
</pallas_src>

<mosaic_0001>
module attributes {stable_mosaic.version = 11 : i64} {
  func.func @_harmonic_kernel(%arg0: i32, %arg1: memref<8x192xf32, #tpu.memory_space<vmem>>, %arg2: memref<192x1152xf32, #tpu.memory_space<vmem>>, %arg3: memref<8x1152xf32, #tpu.memory_space<vmem>>, %arg4: memref<8x1152xf32, #tpu.memory_space<vmem>>) attributes {dimension_semantics = [#tpu.dimension_semantics<parallel>], iteration_bounds = array<i64: 1>, scalar_prefetch = 0 : i64, scratch_operands = 0 : i64, tpu.core_type = #tpu.core_type<tc>, window_params = [{transform_indices = @transform_0, window_bounds = array<i64: 8, 192>}, {pipeline_mode = #tpu.pipeline_mode<synchronous>, transform_indices = @transform_1, window_bounds = array<i64: 192, 1152>}, {transform_indices = @transform_2, window_bounds = array<i64: 8, 1152>}, {transform_indices = @transform_3, window_bounds = array<i64: 8, 1152>}]} {
    %c0 = arith.constant 0 : index
    %c0_0 = arith.constant 0 : index
    %0 = vector.load %arg1[%c0, %c0_0] : memref<8x192xf32, #tpu.memory_space<vmem>>, vector<8x192xf32>
    %c0_1 = arith.constant 0 : index
    %c0_2 = arith.constant 0 : index
    %1 = vector.load %arg2[%c0_1, %c0_2] : memref<192x1152xf32, #tpu.memory_space<vmem>>, vector<192x1152xf32>
    %cst = arith.constant dense<0.000000e+00> : vector<8x1152xf32>
    %2 = tpu.matmul %0, %1, %cst {dimension_numbers = #tpu.dot_dimension_numbers<[1], [0], [0], [1], [0, 0, 1, 1], [], []>} : vector<8x192xf32>, vector<192x1152xf32>, vector<8x1152xf32> -> vector<8x1152xf32>
    %3 = math.sin %2 : vector<8x1152xf32>
    %c0_3 = arith.constant 0 : index
    %c0_4 = arith.constant 0 : index
    %4 = vector.load %arg3[%c0_3, %c0_4] : memref<8x1152xf32, #tpu.memory_space<vmem>>, vector<8x1152xf32>
    tpu.vector_store %arg3[%c0_3, %c0_4], %3 {strides = array<i32>} : memref<8x1152xf32, #tpu.memory_space<vmem>>, vector<8x1152xf32>,
    %5 = math.cos %2 : vector<8x1152xf32>
    %c0_5 = arith.constant 0 : index
    %c0_6 = arith.constant 0 : index
    %6 = vector.load %arg4[%c0_5, %c0_6] : memref<8x1152xf32, #tpu.memory_space<vmem>>, vector<8x1152xf32>
    tpu.vector_store %arg4[%c0_5, %c0_6], %5 {strides = array<i32>} : memref<8x1152xf32, #tpu.memory_space<vmem>>, vector<8x1152xf32>,
    return
  }
  func.func @transform_0(%arg0: i32) -> (i32, i32) {
    %c0_i32 = arith.constant 0 : i32
    %c0_i32_0 = arith.constant 0 : i32
    return %arg0, %c0_i32 : i32, i32
  }
  func.func @transform_1(%arg0: i32) -> (i32, i32) {
    %c0_i32 = arith.constant 0 : i32
    %c0_i32_0 = arith.constant 0 : i32
    %c0_i32_1 = arith.constant 0 : i32
    return %c0_i32, %c0_i32_0 : i32, i32
  }
  func.func @transform_2(%arg0: i32) -> (i32, i32) {
    %c0_i32 = arith.constant 0 : i32
    %c0_i32_0 = arith.constant 0 : i32
    return %arg0, %c0_i32 : i32, i32
  }
  func.func @transform_3(%arg0: i32) -> (i32, i32) {
    %c0_i32 = arith.constant 0 : i32
    %c0_i32_0 = arith.constant 0 : i32
    return %arg0, %c0_i32 : i32, i32
  }
}

</mosaic_0001>

<bundles_post_ra>
// kernel: tpu_custom_call.1
= control target key start
LH: loop header
LB: loop body
LE: loop exit
PB: predicated region body
PF: predicated region fallthrough
CT: control target
= control target key end

     0   :  { %9 = vsyncpa [#allocation3], 0  ;;  %s3957_s0 = inlined_call_operand.hbm [shape: f32[8,192], index: 0, kind: input, shape index: {}]   ;;  %s3958_s1 = inlined_call_operand.hbm [shape: f32[192,1152], index: 1, kind: input, shape index: {}]   ;;  %s3959_s2 = inlined_call_operand.hbm [shape: f32[8,1152], index: 2, kind: output, shape index: {0}]   ;;  %s3960_s3 = inlined_call_operand.hbm [shape: f32[8,1152], index: 3, kind: output, shape index: {1}]  }
   0x1   :  { %10 = vsyncpa [#allocation6], 0 }
   0x2   :  { %11 = vsyncpa [#allocation4], 0 }
   0x3   :  { %12 = vsyncpa [#allocation9], 0  ;;  %s3014_s12 = smov [#allocation2]   ;;  %s3015_s14 = smov [#allocation5]  }
   0x4   :  { %s19_s13 = sshll.u32 %s3014_s12, 4  ;;  %s28_s15 = sshll.u32 %s3015_s14, 4  ;;  %s20_s13 = int_to_ptr.vmem [resolvable:$true] %s19_s13  ;;  %s3047_s15 = int_to_ptr.vmem [resolvable:$true] %s28_s15 }
   0x5   :  { %s2918_s18 = scalar_lea.hbm %s3957_s0, 256 }
   0x6   :  { %p2919_p0 = scmp.ne.s32.totalorder %s3957_s0, %s2918_s18  ;;  %p2922_p1 = scmp.lt.u32.totalorder %s2918_s18, %s3957_s0 }
   0x8   :  { %p2924_p2 = pnand %p2922_p1, %p2919_p0 }
   0xa   :  { %2927 = shalt.err (!%p2924_p2)
}
   0xb   :  { %s2928_s23 = scalar_lea.vmem %s20_s13, 256  ;;  %p2933_p4 = scmp.lt.s32.totalorder %s20_s13, %s20_s13 }
   0xc   :  { %p2929_p3 = scmp.ne.s32.totalorder %s20_s13, %s2928_s23  ;;  %p2934_p5 = scmp.lt.s32.totalorder %s2928_s23, %s2928_s23 }
   0xe   :  { %p2935_p6 = por %p2934_p5, %p2933_p4 }
  0x10   :  { %p2936_p7 = pnand %p2935_p6, %p2929_p3 }
  0x12   :  { %2939 = shalt.err (!%p2936_p7)
}
  0x13   :  { %22 = dma.hbm_to_vmem [thread:$0]  %s3957_s0, 256, %s20_s13, [#allocation3]  }
  0x14   :  { %s2940_s28 = scalar_lea.hbm %s3958_s1, 27648 }
  0x15   :  { %p2941_p8 = scmp.ne.s32.totalorder %s3958_s1, %s2940_s28  ;;  %p2944_p9 = scmp.lt.u32.totalorder %s2940_s28, %s3958_s1 }
  0x17   :  { %p2946_p10 = pnand %p2944_p9, %p2941_p8 }
  0x19   :  { %2949 = shalt.err (!%p2946_p10)
}
  0x1a   :  { %s2950_s6 = scalar_lea.vmem %s3047_s15, 27648  ;;  %p2955_p12 = scmp.lt.s32.totalorder %s3047_s15, %s3047_s15 }
  0x1b   :  { %p2951_p11 = scmp.ne.s32.totalorder %s3047_s15, %s2950_s6  ;;  %p2956_p13 = scmp.lt.s32.totalorder %s2950_s6, %s2950_s6 }
  0x1d   :  { %p2957_p0 = por %p2956_p13, %p2955_p12 }
  0x1f   :  { %p2958_p1 = pnand %p2957_p0, %p2951_p11 }
  0x21   :  { %2961 = shalt.err (!%p2958_p1)
}
  0x22   :  { %s3016_s0 = smov 1152   ;;  %s3017_s7 = smov 72  }
  0x23   :  { %34 = dma.hbm_to_vmem [thread:$0]  %s3958_s1, 27648, %s3047_s15, [#allocation6], %s3016_s0, %s3016_s0, %s3017_s7  }
  0x24   :  { %3006 = dma.done.wait [#allocation3], 256  }
  0x25   :  { %3007 = vsyncadd [#allocation3], 4294967040 }
  0x26   :  { %3008 = dma.done.wait [#allocation6], 27648  }
  0x27   :  { %3009 = vsyncadd [#allocation6], 4294939648  ;;  %v44_v0 = vld [vmem:[#allocation5 + $0x8] sm:$0xff]  ;;  %v53_v1 = vld [vmem:[#allocation5 + $0x50] sm:$0xff]  ;;  %vm259_vm0 = vcmask 523264   ;;  %s3025_s1 = smov [#allocation7]  }
  0x28   :  { %v46_v2 = vld [vmem:[#allocation5 + $0x18] sm:$0xff]  ;;  %v2605_v3 = vpack.c.bf16 %v53_v1, %v44_v0  ;;  %v55_v4 = vld [vmem:[#allocation5 + $0x60] sm:$0xff]  ;;  %v52_v6 = vld [vmem:[#allocation5 + $0x48] sm:$0xff]  ;;  %s2504_s10 = sshll.u32 %s3025_s1, 4  ;;  %s3026_s11 = smov [#allocation8]   ;;  %s2505_s10 = int_to_ptr.vmem [resolvable:$true] %s2504_s10 }
  0x29   :  { %v43_v5 = vld [vmem:[#allocation5] sm:$0xff]  ;;  %v2653_v7 = vpack.c.bf16 %v55_v4, %v46_v2  ;;  %v45_v9 = vld [vmem:[#allocation5 + $0x10] sm:$0xff]  ;;  %v54_v10 = vld [vmem:[#allocation5 + $0x58] sm:$0xff]  ;;  %s2514_s12 = sshll.u32 %s3026_s11, 4  ;;  %s2962_s13 = scalar_lea.vmem %s2505_s10, 1152  ;;  %s2515_s12 = int_to_ptr.vmem [resolvable:$true] %s2514_s12 }
  0x2a   :  { %v2607_v8 = vpack.c.bf16 %v52_v6, %v43_v5  ;;  %v62_v11 = vld [vmem:[#allocation5 + $0x98] sm:$0xff]  ;;  %2606 = vmatprep.subr.bf16.mxu0 %v2605_v3  ;;  %v2655_v12 = vpack.c.bf16 %v54_v10, %v45_v9  ;;  %v71_v13 = vld [vmem:[#allocation5 + $0xe0] sm:$0xff]  ;;  %v64_v14 = vld [vmem:[#allocation5 + $0xa8] sm:$0xff]  ;;  %p2963_p2 = scmp.ne.s32.totalorder %s2505_s10, %s2962_s13  ;;  %p2967_p3 = scmp.lt.s32.totalorder %s2505_s10, %s2505_s10 }
  0x2b   :  { %v73_v15 = vld [vmem:[#allocation5 + $0xf0] sm:$0xff]  ;;  %2654 = vmatprep.subr.bf16.mxu1 %v2653_v7  ;;  %v2609_v16 = vpack.c.bf16 %v71_v13, %v62_v11  ;;  %v70_v19 = vld [vmem:[#allocation5 + $0xd8] sm:$0xff]  ;;  %v63_v20 = vld [vmem:[#allocation5 + $0xa0] sm:$0xff]  ;;  %p2968_p4 = scmp.lt.s32.totalorder %s2962_s13, %s2962_s13 }
  0x2c   :  { %2608 = vmatpush1.bf16.msra.mxu0 %v2607_v8  ;;  %v2657_v17 = vpack.c.bf16 %v73_v15, %v64_v14  ;;  %v61_v18 = vld [vmem:[#allocation5 + $0x90] sm:$0xff]  ;;  %2656 = vmatpush1.bf16.msra.mxu1 %v2655_v12  ;;  %v72_v22 = vld [vmem:[#allocation5 + $0xe8] sm:$0xff]  ;;  %v82_v27 = vld [vmem:[#allocation5 + $0x138] sm:$0xff] }
  0x2d   :  { %v2611_v21 = vpack.c.bf16 %v70_v19, %v61_v18  ;;  %v80_v23 = vld [vmem:[#allocation5 + $0x128] sm:$0xff]  ;;  %v89_v24 = vld [vmem:[#allocation5 + $0x170] sm:$0xff]  ;;  %2610 = vmatprep.subr.bf16.mxu0 %v2609_v16  ;;  %v2659_v25 = vpack.c.bf16 %v72_v22, %v63_v20  ;;  %v91_v28 = vld [vmem:[#allocation5 + $0x180] sm:$0xff]  ;;  %p2969_p5 = por %p2968_p4, %p2967_p3 }
  0x2e   :  { %2658 = vmatprep.subr.bf16.mxu1 %v2657_v17  ;;  %v2613_v26 = vpack.c.bf16 %v89_v24, %v80_v23  ;;  %v79_v29 = vld [vmem:[#allocation5 + $0x120] sm:$0xff]  ;;  %v2661_v30 = vpack.c.bf16 %v91_v28, %v82_v27  ;;  %v88_v31 = vld [vmem:[#allocation5 + $0x168] sm:$0xff]  ;;  %v81_v32 = vld [vmem:[#allocation5 + $0x130] sm:$0xff] }
  0x2f   :  { %v90_v33 = vld [vmem:[#allocation5 + $0x178] sm:$0xff]  ;;  %v2615_v34 = vpack.c.bf16 %v88_v31, %v79_v29  ;;  %v107_v36 = vld [vmem:[#allocation5 + $0x200] sm:$0xff]  ;;  %v100_v37 = vld [vmem:[#allocation5 + $0x1c8] sm:$0xff]  ;;  %p2970_p6 = pnand %p2969_p5, %p2963_p2 }
  0x30   :  { %2612 = vmatpush1.bf16.msra.mxu0 %v2611_v21  ;;  %v98_v35 = vld [vmem:[#allocation5 + $0x1b8] sm:$0xff]  ;;  %2660 = vmatpush1.bf16.msra.mxu1 %v2659_v25  ;;  %v2663_v38 = vpack.c.bf16 %v90_v33, %v81_v32  ;;  %v109_v40 = vld [vmem:[#allocation5 + $0x210] sm:$0xff]  ;;  %v99_v44 = vld [vmem:[#allocation5 + $0x1c0] sm:$0xff] }
  0x31   :  { %2614 = vmatprep.subr.bf16.mxu0 %v2613_v26  ;;  %v2617_v39 = vpack.c.bf16 %v107_v36, %v98_v35  ;;  %v97_v41 = vld [vmem:[#allocation5 + $0x1b0] sm:$0xff]  ;;  %v106_v42 = vld [vmem:[#allocation5 + $0x1f8] sm:$0xff]  ;;  %2662 = vmatprep.subr.bf16.mxu1 %v2661_v30  ;;  %v2665_v43 = vpack.c.bf16 %v109_v40, %v100_v37  ;;  %v108_v45 = vld [vmem:[#allocation5 + $0x208] sm:$0xff] }
  0x32   :  { %v116_v46 = vld [vmem:[#allocation5 + $0x248] sm:$0xff]  ;;  %v125_v47 = vld [vmem:[#allocation5 + $0x290] sm:$0xff]  ;;  %v118_v48 = vld [vmem:[#allocation5 + $0x258] sm:$0xff]  ;;  %v2619_v50 = vpack.c.bf16 %v106_v42, %v97_v41  ;;  %v2667_v51 = vpack.c.bf16 %v108_v45, %v99_v44 }
  0x33   :  { %v127_v49 = vld [vmem:[#allocation5 + $0x2a0] sm:$0xff]  ;;  %v2621_v52 = vpack.c.bf16 %v125_v47, %v116_v46  ;;  %v124_v54 = vld [vmem:[#allocation5 + $0x288] sm:$0xff]  ;;  %v117_v55 = vld [vmem:[#allocation5 + $0x250] sm:$0xff] }
  0x34   :  { %2616 = vmatpush1.bf16.msra.mxu0 %v2615_v34  ;;  %2664 = vmatpush1.bf16.msra.mxu1 %v2663_v38  ;;  %v115_v53 = vld [vmem:[#allocation5 + $0x240] sm:$0xff]  ;;  %v2669_v56 = vpack.c.bf16 %v127_v49, %v118_v48  ;;  %v126_v57 = vld [vmem:[#allocation5 + $0x298] sm:$0xff]  ;;  %v136_v60 = vld [vmem:[#allocation5 + $0x2e8] sm:$0xff] }
  0x35   :  { %2618 = vmatprep.subr.bf16.mxu0 %v2617_v39  ;;  %2666 = vmatprep.subr.bf16.mxu1 %v2665_v43  ;;  %v134_v58 = vld [vmem:[#allocation5 + $0x2d8] sm:$0xff]  ;;  %v143_v59 = vld [vmem:[#allocation5 + $0x320] sm:$0xff]  ;;  %v145_v61 = vld [vmem:[#allocation5 + $0x330] sm:$0xff]  ;;  %v2623_v62 = vpack.c.bf16 %v124_v54, %v115_v53  ;;  %v2671_v63 = vpack.c.bf16 %v126_v57, %v117_v55 }
  0x36   :  { %v2625_v0 = vpack.c.bf16 %v143_v59, %v134_v58  ;;  %v133_v1 = vld [vmem:[#allocation5 + $0x2d0] sm:$0xff]  ;;  %v142_v2 = vld [vmem:[#allocation5 + $0x318] sm:$0xff]  ;;  %v135_v3 = vld [vmem:[#allocation5 + $0x2e0] sm:$0xff]  ;;  %v2673_v4 = vpack.c.bf16 %v145_v61, %v136_v60 }
  0x37   :  { %v144_v5 = vld [vmem:[#allocation5 + $0x328] sm:$0xff]  ;;  %v161_v7 = vld [vmem:[#allocation5 + $0x3b0] sm:$0xff]  ;;  %v154_v8 = vld [vmem:[#allocation5 + $0x378] sm:$0xff]  ;;  %v2627_v10 = vpack.c.bf16 %v142_v2, %v133_v1 }
  0x38   :  { %2620 = vmatpush1.bf16.msra.mxu0 %v2619_v50  ;;  %2668 = vmatpush1.bf16.msra.mxu1 %v2667_v51  ;;  %v152_v6 = vld [vmem:[#allocation5 + $0x368] sm:$0xff]  ;;  %v163_v9 = vld [vmem:[#allocation5 + $0x3c0] sm:$0xff]  ;;  %v2675_v11 = vpack.c.bf16 %v144_v5, %v135_v3  ;;  %v153_v15 = vld [vmem:[#allocation5 + $0x370] sm:$0xff] }
  0x39   :  { %2622 = vmatprep.subr.bf16.mxu0 %v2621_v52  ;;  %2670 = vmatprep.subr.bf16.mxu1 %v2669_v56  ;;  %v2629_v12 = vpack.c.bf16 %v161_v7, %v152_v6  ;;  %v151_v13 = vld [vmem:[#allocation5 + $0x360] sm:$0xff]  ;;  %v160_v14 = vld [vmem:[#allocation5 + $0x3a8] sm:$0xff]  ;;  %v2677_v16 = vpack.c.bf16 %v163_v9, %v154_v8  ;;  %v162_v17 = vld [vmem:[#allocation5 + $0x3b8] sm:$0xff] }
  0x3a   :  { %v170_v18 = vld [vmem:[#allocation5 + $0x3f8] sm:$0xff]  ;;  %v179_v19 = vld [vmem:[#allocation5 + $0x440] sm:$0xff]  ;;  %v172_v20 = vld [vmem:[#allocation5 + $0x408] sm:$0xff]  ;;  %v2631_v22 = vpack.c.bf16 %v160_v14, %v151_v13  ;;  %v2679_v23 = vpack.c.bf16 %v162_v17, %v153_v15 }
  0x3b   :  { %v181_v21 = vld [vmem:[#allocation5 + $0x450] sm:$0xff]  ;;  %v2633_v24 = vpack.c.bf16 %v179_v19, %v170_v18  ;;  %v178_v26 = vld [vmem:[#allocation5 + $0x438] sm:$0xff]  ;;  %v171_v27 = vld [vmem:[#allocation5 + $0x400] sm:$0xff] }
  0x3c   :  { %2624 = vmatpush1.bf16.msra.mxu0 %v2623_v62  ;;  %2672 = vmatpush1.bf16.msra.mxu1 %v2671_v63  ;;  %v169_v25 = vld [vmem:[#allocation5 + $0x3f0] sm:$0xff]  ;;  %v2681_v28 = vpack.c.bf16 %v181_v21, %v172_v20  ;;  %v180_v29 = vld [vmem:[#allocation5 + $0x448] sm:$0xff]  ;;  %v190_v32 = vld [vmem:[#allocation5 + $0x498] sm:$0xff] }
  0x3d   :  { %2626 = vmatprep.subr.bf16.mxu0 %v2625_v0  ;;  %2674 = vmatprep.subr.bf16.mxu1 %v2673_v4  ;;  %v188_v30 = vld [vmem:[#allocation5 + $0x488] sm:$0xff]  ;;  %v197_v31 = vld [vmem:[#allocation5 + $0x4d0] sm:$0xff]  ;;  %v199_v33 = vld [vmem:[#allocation5 + $0x4e0] sm:$0xff]  ;;  %v2635_v34 = vpack.c.bf16 %v178_v26, %v169_v25  ;;  %v2683_v35 = vpack.c.bf16 %v180_v29, %v171_v27 }
  0x3e   :  { %v2637_v36 = vpack.c.bf16 %v197_v31, %v188_v30  ;;  %v187_v37 = vld [vmem:[#allocation5 + $0x480] sm:$0xff]  ;;  %v196_v38 = vld [vmem:[#allocation5 + $0x4c8] sm:$0xff]  ;;  %v189_v39 = vld [vmem:[#allocation5 + $0x490] sm:$0xff]  ;;  %v2685_v40 = vpack.c.bf16 %v199_v33, %v190_v32 }
  0x3f   :  { %v198_v41 = vld [vmem:[#allocation5 + $0x4d8] sm:$0xff]  ;;  %v215_v43 = vld [vmem:[#allocation5 + $0x560] sm:$0xff]  ;;  %v208_v44 = vld [vmem:[#allocation5 + $0x528] sm:$0xff]  ;;  %v2639_v46 = vpack.c.bf16 %v196_v38, %v187_v37 }
  0x40   :  { %2628 = vmatpush1.bf16.msra.mxu0 %v2627_v10  ;;  %2676 = vmatpush1.bf16.msra.mxu1 %v2675_v11  ;;  %v206_v42 = vld [vmem:[#allocation5 + $0x518] sm:$0xff]  ;;  %v217_v45 = vld [vmem:[#allocation5 + $0x570] sm:$0xff]  ;;  %v2687_v48 = vpack.c.bf16 %v198_v41, %v189_v39  ;;  %v207_v52 = vld [vmem:[#allocation5 + $0x520] sm:$0xff] }
  0x41   :  { %2630 = vmatprep.subr.bf16.mxu0 %v2629_v12  ;;  %2678 = vmatprep.subr.bf16.mxu1 %v2677_v16  ;;  %v3078_v47 = vld [vmem:[#allocation2 + $0x8] sm:$0xff]  ;;  %v2641_v49 = vpack.c.bf16 %v215_v43, %v206_v42  ;;  %v205_v50 = vld [vmem:[#allocation5 + $0x510] sm:$0xff]  ;;  %v2689_v53 = vpack.c.bf16 %v217_v45, %v208_v44  ;;  %v216_v54 = vld [vmem:[#allocation5 + $0x568] sm:$0xff] }
  0x42   :  { %v214_v51 = vld [vmem:[#allocation5 + $0x558] sm:$0xff]  ;;  %v224_v55 = vld [vmem:[#allocation5 + $0x5a8] sm:$0xff]  ;;  %v233_v56 = vld [vmem:[#allocation5 + $0x5f0] sm:$0xff]  ;;  %2528 = vmatprep.mubr.msk.f32.mxu0 %vm259_vm0, %v3078_v47  ;;  %2529 = vmatprep.mubr.msk.f32.mxu1 %vm259_vm0, %v3078_v47  ;;  %v2691_v60 = vpack.c.bf16 %v216_v54, %v207_v52 }
  0x43   :  { %v226_v57 = vld [vmem:[#allocation5 + $0x5b8] sm:$0xff]  ;;  %v235_v58 = vld [vmem:[#allocation5 + $0x600] sm:$0xff]  ;;  %v2643_v59 = vpack.c.bf16 %v214_v51, %v205_v50  ;;  %v2645_v61 = vpack.c.bf16 %v233_v56, %v224_v55  ;;  %v232_v63 = vld [vmem:[#allocation5 + $0x5e8] sm:$0xff] }
  0x44   :  { %2632 = vmatpush1.bf16.msra.mxu0 %v2631_v22  ;;  %2680 = vmatpush1.bf16.msra.mxu1 %v2679_v23  ;;  %v223_v62 = vld [vmem:[#allocation5 + $0x5a0] sm:$0xff]  ;;  %v225_v0 = vld [vmem:[#allocation5 + $0x5b0] sm:$0xff]  ;;  %v2693_v1 = vpack.c.bf16 %v235_v58, %v226_v57  ;;  %v234_v2 = vld [vmem:[#allocation5 + $0x5f8] sm:$0xff] }
  0x45   :  { %2634 = vmatprep.subr.bf16.mxu0 %v2633_v24  ;;  %2682 = vmatprep.subr.bf16.mxu1 %v2681_v28  ;;  %v242_v3 = vld [vmem:[#allocation5 + $0x638] sm:$0xff]  ;;  %v251_v4 = vld [vmem:[#allocation5 + $0x680] sm:$0xff]  ;;  %v244_v5 = vld [vmem:[#allocation5 + $0x648] sm:$0xff]  ;;  %v2647_v7 = vpack.c.bf16 %v232_v63, %v223_v62  ;;  %v2695_v8 = vpack.c.bf16 %v234_v2, %v225_v0 }
  0x46   :  { %v253_v6 = vld [vmem:[#allocation5 + $0x690] sm:$0xff]  ;;  %v2649_v9 = vpack.c.bf16 %v251_v4, %v242_v3  ;;  %v250_v11 = vld [vmem:[#allocation5 + $0x678] sm:$0xff]  ;;  %v243_v12 = vld [vmem:[#allocation5 + $0x640] sm:$0xff] }
  0x47   :  { %v241_v10 = vld [vmem:[#allocation5 + $0x630] sm:$0xff]  ;;  %v2697_v13 = vpack.c.bf16 %v253_v6, %v244_v5  ;;  %v252_v14 = vld [vmem:[#allocation5 + $0x688] sm:$0xff]  ;;  %v50_v17 = vld [vmem:[#allocation5 + $0x38] sm:$0xff] }
  0x48   :  { %2636 = vmatpush1.bf16.msra.mxu0 %v2635_v34  ;;  %2684 = vmatpush1.bf16.msra.mxu1 %v2683_v35  ;;  %v48_v15 = vld [vmem:[#allocation5 + $0x28] sm:$0xff]  ;;  %v57_v16 = vld [vmem:[#allocation5 + $0x70] sm:$0xff]  ;;  %v59_v18 = vld [vmem:[#allocation5 + $0x80] sm:$0xff]  ;;  %v2651_v19 = vpack.c.bf16 %v250_v11, %v241_v10  ;;  %v2699_v20 = vpack.c.bf16 %v252_v14, %v243_v12 }
  0x49   :  { %2638 = vmatprep.subr.bf16.mxu0 %v2637_v36  ;;  %2686 = vmatprep.subr.bf16.mxu1 %v2685_v40  ;;  %v2701_v21 = vpack.c.bf16 %v57_v16, %v48_v15  ;;  %v47_v22 = vld [vmem:[#allocation5 + $0x20] sm:$0xff]  ;;  %v56_v23 = vld [vmem:[#allocation5 + $0x68] sm:$0xff]  ;;  %v49_v24 = vld [vmem:[#allocation5 + $0x30] sm:$0xff]  ;;  %v2749_v25 = vpack.c.bf16 %v59_v18, %v50_v17 }
  0x4a   :  { %v58_v26 = vld [vmem:[#allocation5 + $0x78] sm:$0xff]  ;;  %v75_v28 = vld [vmem:[#allocation5 + $0x100] sm:$0xff]  ;;  %v68_v29 = vld [vmem:[#allocation5 + $0xc8] sm:$0xff]  ;;  %v2703_v32 = vpack.c.bf16 %v56_v23, %v47_v22 }
  0x4b   :  { %v66_v27 = vld [vmem:[#allocation5 + $0xb8] sm:$0xff]  ;;  %v77_v30 = vld [vmem:[#allocation5 + $0x110] sm:$0xff]  ;;  %v2751_v33 = vpack.c.bf16 %v58_v26, %v49_v24  ;;  %v67_v37 = vld [vmem:[#allocation5 + $0xc0] sm:$0xff] }
  0x4c   :  { %2640 = vmatpush1.bf16.msra.mxu0 %v2639_v46  ;;  %2688 = vmatpush1.bf16.msra.mxu1 %v2687_v48  ;;  %v3084_v31 = vld [vmem:[#allocation2] sm:$0xff]  ;;  %v2705_v34 = vpack.c.bf16 %v75_v28, %v66_v27  ;;  %v74_v36 = vld [vmem:[#allocation5 + $0xf8] sm:$0xff]  ;;  %v2753_v38 = vpack.c.bf16 %v77_v30, %v68_v29  ;;  %v76_v39 = vld [vmem:[#allocation5 + $0x108] sm:$0xff] }
  0x4d   :  { %2642 = vmatprep.subr.bf16.mxu0 %v2641_v49  ;;  %2690 = vmatprep.subr.bf16.mxu1 %v2689_v53  ;;  %v65_v35 = vld [vmem:[#allocation5 + $0xb0] sm:$0xff]  ;;  %v84_v40 = vld [vmem:[#allocation5 + $0x148] sm:$0xff]  ;;  %v86_v42 = vld [vmem:[#allocation5 + $0x158] sm:$0xff]  ;;  %v2755_v45 = vpack.c.bf16 %v76_v39, %v67_v37 }
  0x4e   :  { %v93_v41 = vld [vmem:[#allocation5 + $0x190] sm:$0xff]  ;;  %v95_v43 = vld [vmem:[#allocation5 + $0x1a0] sm:$0xff]  ;;  %v2707_v44 = vpack.c.bf16 %v74_v36, %v65_v35  ;;  %v92_v49 = vld [vmem:[#allocation5 + $0x188] sm:$0xff] }
  0x4f   :  { %v2709_v46 = vpack.c.bf16 %v93_v41, %v84_v40  ;;  %v83_v48 = vld [vmem:[#allocation5 + $0x140] sm:$0xff]  ;;  %v85_v50 = vld [vmem:[#allocation5 + $0x150] sm:$0xff]  ;;  %v2757_v51 = vpack.c.bf16 %v95_v43, %v86_v42  ;;  %v94_v52 = vld [vmem:[#allocation5 + $0x198] sm:$0xff] }
  0x50   :  { %2644 = vmatpush1.bf16.msra.mxu0 %v2643_v59  ;;  %2692 = vmatpush1.bf16.msra.mxu1 %v2691_v60  ;;  %v102_v53 = vld [vmem:[#allocation5 + $0x1d8] sm:$0xff]  ;;  %v111_v54 = vld [vmem:[#allocation5 + $0x220] sm:$0xff]  ;;  %v104_v55 = vld [vmem:[#allocation5 + $0x1e8] sm:$0xff]  ;;  %v2711_v57 = vpack.c.bf16 %v92_v49, %v83_v48  ;;  %v2759_v58 = vpack.c.bf16 %v94_v52, %v85_v50 }
  0x51   :  { %2646 = vmatprep.subr.bf16.mxu0 %v2645_v61  ;;  %2694 = vmatprep.subr.bf16.mxu1 %v2693_v1  ;;  %v113_v56 = vld [vmem:[#allocation5 + $0x230] sm:$0xff]  ;;  %v2713_v59 = vpack.c.bf16 %v111_v54, %v102_v53  ;;  %v110_v61 = vld [vmem:[#allocation5 + $0x218] sm:$0xff]  ;;  %v103_v62 = vld [vmem:[#allocation5 + $0x1e0] sm:$0xff] }
  0x52   :  { %v101_v60 = vld [vmem:[#allocation5 + $0x1d0] sm:$0xff]  ;;  %v2761_v63 = vpack.c.bf16 %v113_v56, %v104_v55  ;;  %v112_v0 = vld [vmem:[#allocation5 + $0x228] sm:$0xff]  ;;  %v122_v3 = vld [vmem:[#allocation5 + $0x278] sm:$0xff] }
  0x53   :  { %v120_v1 = vld [vmem:[#allocation5 + $0x268] sm:$0xff]  ;;  %v129_v2 = vld [vmem:[#allocation5 + $0x2b0] sm:$0xff]  ;;  %v131_v4 = vld [vmem:[#allocation5 + $0x2c0] sm:$0xff]  ;;  %v2715_v5 = vpack.c.bf16 %v110_v61, %v101_v60  ;;  %v2763_v6 = vpack.c.bf16 %v112_v0, %v103_v62 }
  0x54   :  { %2648 = vmatpush1.bf16.msra.mxu0 %v2647_v7  ;;  %2696 = vmatpush1.bf16.msra.mxu1 %v2695_v8  ;;  %v2717_v7 = vpack.c.bf16 %v129_v2, %v120_v1  ;;  %v119_v8 = vld [vmem:[#allocation5 + $0x260] sm:$0xff]  ;;  %v121_v10 = vld [vmem:[#allocation5 + $0x270] sm:$0xff]  ;;  %v2765_v11 = vpack.c.bf16 %v131_v4, %v122_v3  ;;  %v130_v12 = vld [vmem:[#allocation5 + $0x2b8] sm:$0xff] }
  0x55   :  { %2650 = vmatprep.subr.bf16.mxu0 %v2649_v9  ;;  %2698 = vmatprep.subr.bf16.mxu1 %v2697_v13  ;;  %v128_v9 = vld [vmem:[#allocation5 + $0x2a8] sm:$0xff]  ;;  %v138_v13 = vld [vmem:[#allocation5 + $0x2f8] sm:$0xff]  ;;  %v147_v14 = vld [vmem:[#allocation5 + $0x340] sm:$0xff]  ;;  %v2767_v18 = vpack.c.bf16 %v130_v12, %v121_v10 }
  0x56   :  { %v140_v15 = vld [vmem:[#allocation5 + $0x308] sm:$0xff]  ;;  %v149_v16 = vld [vmem:[#allocation5 + $0x350] sm:$0xff]  ;;  %v2719_v17 = vpack.c.bf16 %v128_v9, %v119_v8  ;;  %v139_v22 = vld [vmem:[#allocation5 + $0x300] sm:$0xff] }
  0x57   :  { %v2769_v23 = vpack.c.bf16 %v149_v16, %v140_v15  ;;  %v148_v24 = vld [vmem:[#allocation5 + $0x348] sm:$0xff]  ;;  %v165_v26 = vld [vmem:[#allocation5 + $0x3d0] sm:$0xff]  ;;  %v158_v27 = vld [vmem:[#allocation5 + $0x398] sm:$0xff] }
  0x58   :  { %2652 = vmatpush1.bf16.msra.mxu0 %v2651_v19  ;;  %2700 = vmatpush1.bf16.msra.mxu1 %v2699_v20  ;;  %v2721_v19 = vpack.c.bf16 %v147_v14, %v138_v13  ;;  %v137_v20 = vld [vmem:[#allocation5 + $0x2f0] sm:$0xff]  ;;  %v167_v28 = vld [vmem:[#allocation5 + $0x3e0] sm:$0xff]  ;;  %v2771_v30 = vpack.c.bf16 %v148_v24, %v139_v22  ;;  %v166_v37 = vld [vmem:[#allocation5 + $0x3d8] sm:$0xff] }
  0x59   :  { %2702 = vmatprep.subr.bf16.mxu0 %v2701_v21  ;;  %2750 = vmatprep.subr.bf16.mxu1 %v2749_v25  ;;  %v146_v21 = vld [vmem:[#allocation5 + $0x338] sm:$0xff]  ;;  %v156_v25 = vld [vmem:[#allocation5 + $0x388] sm:$0xff]  ;;  %v157_v35 = vld [vmem:[#allocation5 + $0x390] sm:$0xff]  ;;  %v2773_v36 = vpack.c.bf16 %v167_v28, %v158_v27 }
  0x5a   :  { %v2723_v29 = vpack.c.bf16 %v146_v21, %v137_v20  ;;  %v183_v39 = vld [vmem:[#allocation5 + $0x460] sm:$0xff]  ;;  %v176_v40 = vld [vmem:[#allocation5 + $0x428] sm:$0xff]  ;;  %v185_v41 = vld [vmem:[#allocation5 + $0x470] sm:$0xff]  ;;  %v2775_v43 = vpack.c.bf16 %v166_v37, %v157_v35 }
  0x5b   :  { %328 = vmatmul.mubr.f32.vlgmr.msra.gmra.mrb[0].mxu0 %v3084_v31  ;;  %399 = vmatmul.mubr.f32.vlgmr.msra.gmra.mrb[0].mxu1 %v3084_v31  ;;  %v175_v48 = vld [vmem:[#allocation5 + $0x420] sm:$0xff]  ;;  %v2777_v49 = vpack.c.bf16 %v185_v41, %v176_v40  ;;  %v184_v50 = vld [vmem:[#allocation5 + $0x468] sm:$0xff]  ;;  %v201_v52 = vld [vmem:[#allocation5 + $0x4f0] sm:$0xff]  ;;  %v3018_v41 = vmov 0.0|0.0  }
  0x5c   :  { %2704 = vmatpush1.bf16.msra.mxu0 %v2703_v32  ;;  %2752 = vmatpush1.bf16.msra.mxu1 %v2751_v33  ;;  %v2725_v32 = vpack.c.bf16 %v165_v26, %v156_v25  ;;  %v155_v33 = vld [vmem:[#allocation5 + $0x380] sm:$0xff]  ;;  %v194_v53 = vld [vmem:[#allocation5 + $0x4b8] sm:$0xff]  ;;  %v2779_v56 = vpack.c.bf16 %v184_v50, %v175_v48  ;;  %v193_v60 = vld [vmem:[#allocation5 + $0x4b0] sm:$0xff] }
  0x5d   :  { %2706 = vmatprep.subr.bf16.mxu0 %v2705_v34  ;;  %2754 = vmatprep.subr.bf16.mxu1 %v2753_v38  ;;  %v164_v34 = vld [vmem:[#allocation5 + $0x3c8] sm:$0xff]  ;;  %v174_v38 = vld [vmem:[#allocation5 + $0x418] sm:$0xff]  ;;  %v203_v54 = vld [vmem:[#allocation5 + $0x500] sm:$0xff] }
  0x5e   :  { %2530 = vmatprep.mubr.msk.f32.mxu0 %vm259_vm0, %v3078_v47  ;;  %2531 = vmatprep.mubr.msk.f32.mxu1 %vm259_vm0, %v3078_v47  ;;  %v2727_v42 = vpack.c.bf16 %v164_v34, %v155_v33  ;;  %v2781_v61 = vpack.c.bf16 %v203_v54, %v194_v53  ;;  %v202_v62 = vld [vmem:[#allocation5 + $0x4f8] sm:$0xff]  ;;  %v219_v0 = vld [vmem:[#allocation5 + $0x580] sm:$0xff]  ;;  %v212_v1 = vld [vmem:[#allocation5 + $0x548] sm:$0xff] }
  0x5f   :  { %v221_v2 = vld [vmem:[#allocation5 + $0x590] sm:$0xff]  ;;  %v2783_v4 = vpack.c.bf16 %v202_v62, %v193_v60  ;;  %v211_v8 = vld [vmem:[#allocation5 + $0x540] sm:$0xff]  ;;  %v220_v10 = vld [vmem:[#allocation5 + $0x588] sm:$0xff] }
  0x60   :  { %2708 = vmatpush1.bf16.msra.mxu0 %v2707_v44  ;;  %2756 = vmatpush1.bf16.msra.mxu1 %v2755_v45  ;;  %v2729_v44 = vpack.c.bf16 %v183_v39, %v174_v38  ;;  %v173_v45 = vld [vmem:[#allocation5 + $0x410] sm:$0xff]  ;;  %v2785_v9 = vpack.c.bf16 %v221_v2, %v212_v1  ;;  %v230_v13 = vld [vmem:[#allocation5 + $0x5d8] sm:$0xff]  ;;  %v239_v14 = vld [vmem:[#allocation5 + $0x620] sm:$0xff]  ;;  %v2787_v16 = vpack.c.bf16 %v220_v10, %v211_v8 }
  0x61   :  { %2710 = vmatprep.subr.bf16.mxu0 %v2709_v46  ;;  %2758 = vmatprep.subr.bf16.mxu1 %v2757_v51  ;;  %v182_v46 = vld [vmem:[#allocation5 + $0x458] sm:$0xff]  ;;  %v192_v51 = vld [vmem:[#allocation5 + $0x4a8] sm:$0xff]  ;;  %v237_v12 = vld [vmem:[#allocation5 + $0x610] sm:$0xff]  ;;  %v2789_v21 = vpack.c.bf16 %v239_v14, %v230_v13 }
  0x62   :  { %v2731_v55 = vpack.c.bf16 %v182_v46, %v173_v45  ;;  %v229_v20 = vld [vmem:[#allocation5 + $0x5d0] sm:$0xff]  ;;  %v238_v22 = vld [vmem:[#allocation5 + $0x618] sm:$0xff]  ;;  %v255_v24 = vld [vmem:[#allocation5 + $0x6a0] sm:$0xff] }
  0x63   :  { %v248_v25 = vld [vmem:[#allocation5 + $0x668] sm:$0xff]  ;;  %v257_v26 = vld [vmem:[#allocation5 + $0x6b0] sm:$0xff]  ;;  %v2791_v28 = vpack.c.bf16 %v238_v22, %v229_v20  ;;  %v247_v34 = vld [vmem:[#allocation5 + $0x660] sm:$0xff] }
  0x64   :  { %2712 = vmatpush1.bf16.msra.mxu0 %v2711_v57  ;;  %2760 = vmatpush1.bf16.msra.mxu1 %v2759_v58  ;;  %v2733_v57 = vpack.c.bf16 %v201_v52, %v192_v51  ;;  %v191_v58 = vld [vmem:[#allocation5 + $0x4a0] sm:$0xff]  ;;  %v2793_v33 = vpack.c.bf16 %v257_v26, %v248_v25  ;;  %v256_v35 = vld [vmem:[#allocation5 + $0x6a8] sm:$0xff]  ;;  %v114_v50 = vld [vmem:[#allocation5 + $0x238] sm:$0xff] }
  0x65   :  { %2714 = vmatprep.subr.bf16.mxu0 %v2713_v59  ;;  %2762 = vmatprep.subr.bf16.mxu1 %v2761_v63  ;;  %v200_v59 = vld [vmem:[#allocation5 + $0x4e8] sm:$0xff]  ;;  %v210_v63 = vld [vmem:[#allocation5 + $0x538] sm:$0xff]  ;;  %v2795_v37 = vpack.c.bf16 %v256_v35, %v247_v34  ;;  %v51_v38 = vld [vmem:[#allocation5 + $0x40] sm:$0xff] }
  0x66   :  { %v2735_v3 = vpack.c.bf16 %v200_v59, %v191_v58  ;;  %v60_v39 = vld [vmem:[#allocation5 + $0x88] sm:$0xff]  ;;  %v87_v45 = vld [vmem:[#allocation5 + $0x160] sm:$0xff]  ;;  %v177_v60 = vld [vmem:[#allocation5 + $0x430] sm:$0xff] }
  0x67   :  { %v2798_v40 = vpack.c.bf16 %v60_v39, %v51_v38  ;;  %v96_v46 = vld [vmem:[#allocation5 + $0x1a8] sm:$0xff]  ;;  %v123_v52 = vld [vmem:[#allocation5 + $0x280] sm:$0xff]  ;;  %v213_v2 = vld [vmem:[#allocation5 + $0x550] sm:$0xff] }
  0x68   :  { %2716 = vmatpush1.bf16.msra.mxu0 %v2715_v5  ;;  %2764 = vmatpush1.bf16.msra.mxu1 %v2763_v6  ;;  %v2737_v5 = vpack.c.bf16 %v219_v0, %v210_v63  ;;  %v209_v6 = vld [vmem:[#allocation5 + $0x530] sm:$0xff]  ;;  %v2804_v48 = vpack.c.bf16 %v96_v46, %v87_v45  ;;  %v132_v53 = vld [vmem:[#allocation5 + $0x2c8] sm:$0xff]  ;;  %v159_v58 = vld [vmem:[#allocation5 + $0x3a0] sm:$0xff] }
  0x69   :  { %2718 = vmatprep.subr.bf16.mxu0 %v2717_v7  ;;  %2766 = vmatprep.subr.bf16.mxu1 %v2765_v11  ;;  %v218_v7 = vld [vmem:[#allocation5 + $0x578] sm:$0xff]  ;;  %v228_v11 = vld [vmem:[#allocation5 + $0x5c8] sm:$0xff]  ;;  %v2810_v54 = vpack.c.bf16 %v132_v53, %v123_v52  ;;  %v195_v63 = vld [vmem:[#allocation5 + $0x4c0] sm:$0xff]  ;;  %v3023_v52 = vmov 920167782  }
  0x6a   :  { %v2739_v15 = vpack.c.bf16 %v218_v7, %v209_v6  ;;  %v204_v0 = vld [vmem:[#allocation5 + $0x508] sm:$0xff]  ;;  %v249_v8 = vld [vmem:[#allocation5 + $0x670] sm:$0xff] }
  0x6b   :  { %v2822_v1 = vpack.c.bf16 %v204_v0, %v195_v63  ;;  %v240_v6 = vld [vmem:[#allocation5 + $0x628] sm:$0xff] }
  0x6c   :  { %2720 = vmatpush1.bf16.msra.mxu0 %v2719_v17  ;;  %2768 = vmatpush1.bf16.msra.mxu1 %v2767_v18  ;;  %v2741_v17 = vpack.c.bf16 %v237_v12, %v228_v11  ;;  %v227_v18 = vld [vmem:[#allocation5 + $0x5c0] sm:$0xff] }
  0x6d   :  { %2722 = vmatprep.subr.bf16.mxu0 %v2721_v19  ;;  %2770 = vmatprep.subr.bf16.mxu1 %v2769_v23  ;;  %v236_v19 = vld [vmem:[#allocation5 + $0x608] sm:$0xff]  ;;  %v246_v23 = vld [vmem:[#allocation5 + $0x658] sm:$0xff] }
  0x6e   :  { %v2743_v27 = vpack.c.bf16 %v236_v19, %v227_v18 }
  0x70   :  { %2724 = vmatpush1.bf16.msra.mxu0 %v2723_v29  ;;  %2772 = vmatpush1.bf16.msra.mxu1 %v2771_v30  ;;  %v2745_v29 = vpack.c.bf16 %v255_v24, %v246_v23  ;;  %v245_v30 = vld [vmem:[#allocation5 + $0x650] sm:$0xff] }
  0x71   :  { %2726 = vmatprep.subr.bf16.mxu0 %v2725_v32  ;;  %2774 = vmatprep.subr.bf16.mxu1 %v2773_v36  ;;  %v254_v32 = vld [vmem:[#allocation5 + $0x698] sm:$0xff] }
  0x72   :  { %v2747_v36 = vpack.c.bf16 %v254_v32, %v245_v30 }
  0x74   :  { %2728 = vmatpush1.bf16.msra.mxu0 %v2727_v42  ;;  %2776 = vmatpush1.bf16.msra.mxu1 %v2775_v43  ;;  %v69_v42 = vld [vmem:[#allocation5 + $0xd0] sm:$0xff]  ;;  %v78_v43 = vld [vmem:[#allocation5 + $0x118] sm:$0xff] }
  0x75   :  { %2730 = vmatprep.subr.bf16.mxu0 %v2729_v44  ;;  %2778 = vmatprep.subr.bf16.mxu1 %v2777_v49  ;;  %v2801_v44 = vpack.c.bf16 %v78_v43, %v69_v42  ;;  %v105_v49 = vld [vmem:[#allocation5 + $0x1f0] sm:$0xff]  ;;  %v3019_v42 = vmov 683565275  }
  0x76   :  { %v2807_v51 = vpack.c.bf16 %v114_v50, %v105_v49  ;;  %v3022_v50 = vmov 2102212464  }
  0x78   :  { %2732 = vmatpush1.bf16.msra.mxu0 %v2731_v55  ;;  %2780 = vmatpush1.bf16.msra.mxu1 %v2779_v56  ;;  %v141_v55 = vld [vmem:[#allocation5 + $0x310] sm:$0xff]  ;;  %v150_v56 = vld [vmem:[#allocation5 + $0x358] sm:$0xff] }
  0x79   :  { %2734 = vmatprep.subr.bf16.mxu0 %v2733_v57  ;;  %2782 = vmatprep.subr.bf16.mxu1 %v2781_v61  ;;  %v2813_v57 = vpack.c.bf16 %v150_v56, %v141_v55  ;;  %v186_v61 = vld [vmem:[#allocation5 + $0x478] sm:$0xff] }
  0x7a   :  { %v2819_v62 = vpack.c.bf16 %v186_v61, %v177_v60 }
  0x7c   :  { %2736 = vmatpush1.bf16.msra.mxu0 %v2735_v3  ;;  %2784 = vmatpush1.bf16.msra.mxu1 %v2783_v4  ;;  %v222_v3 = vld [vmem:[#allocation5 + $0x598] sm:$0xff] }
  0x7d   :  { %2738 = vmatprep.subr.bf16.mxu0 %v2737_v5  ;;  %2786 = vmatprep.subr.bf16.mxu1 %v2785_v9  ;;  %v2825_v4 = vpack.c.bf16 %v222_v3, %v213_v2  ;;  %v231_v5 = vld [vmem:[#allocation5 + $0x5e0] sm:$0xff]  ;;  %v258_v9 = vld [vmem:[#allocation5 + $0x6b8] sm:$0xff] }
  0x7e   :  { %v2828_v7 = vpack.c.bf16 %v240_v6, %v231_v5  ;;  %v2831_v10 = vpack.c.bf16 %v258_v9, %v249_v8 }
  0x80   :  { %2740 = vmatpush1.bf16.msra.mxu0 %v2739_v15  ;;  %2788 = vmatpush1.bf16.msra.mxu1 %v2787_v16 }
  0x81   :  { %2742 = vmatprep.subr.bf16.mxu0 %v2741_v17  ;;  %2790 = vmatprep.subr.bf16.mxu1 %v2789_v21 }
  0x84   :  { %2744 = vmatpush1.bf16.msra.mxu0 %v2743_v27  ;;  %2792 = vmatpush1.bf16.msra.mxu1 %v2791_v28 }
  0x85   :  { %2746 = vmatprep.subr.bf16.mxu0 %v2745_v29  ;;  %2794 = vmatprep.subr.bf16.mxu1 %v2793_v33 }
  0x88   :  { %2748 = vmatpush1.bf16.msra.mxu0 %v2747_v36  ;;  %2796 = vmatpush1.bf16.msra.mxu1 %v2795_v37 }
  0x89   :  { %2797 = vmatprep.subr.bf16.mxu0 %v3018_v41 }
  0x8b   :  { %470 = vmatmul.mubr.f32.vlgmr.msra.gmra.mrb[2].mxu0 %v3084_v31  ;;  %541 = vmatmul.mubr.f32.vlgmr.msra.gmra.mrb[2].mxu1 %v3084_v31 }
  0x8c   :  { %2799 = vmatpush1.bf16.msra.mxu0 %v2798_v40  ;;  %2532 = vmatprep.mubr.msk.f32.mxu0 %vm259_vm0, %v3078_v47  ;;  %v168_v47 = vld [vmem:[#allocation5 + $0x3e8] sm:$0xff] }
  0x8d   :  { %2800 = vmatprep.subr.bf16.mxu0 %v3018_v41  ;;  %v2816_v59 = vpack.c.bf16 %v168_v47, %v159_v58  ;;  %v3024_v47 = vmov 1326507024  }
  0x90   :  { %2802 = vmatpush1.bf16.msra.mxu0 %v2801_v44  ;;  %v3020_v44 = vmov 2475754826  }
  0x91   :  { %2803 = vmatprep.subr.bf16.mxu0 %v3018_v41 }
  0x94   :  { %2805 = vmatpush1.bf16.msra.mxu0 %v2804_v48  ;;  %v3021_v48 = vmov 2131351028  }
  0x95   :  { %2806 = vmatprep.subr.bf16.mxu0 %v3018_v41 }
  0x98   :  { %2808 = vmatpush1.bf16.msra.mxu0 %v2807_v51 }
  0x99   :  { %2809 = vmatprep.subr.bf16.mxu0 %v3018_v41 }
  0x9c   :  { %2811 = vmatpush1.bf16.msra.mxu0 %v2810_v54 }
  0x9d   :  { %2812 = vmatprep.subr.bf16.mxu0 %v3018_v41 }
  0xa0   :  { %2814 = vmatpush1.bf16.msra.mxu0 %v2813_v57 }
  0xa1   :  { %2815 = vmatprep.subr.bf16.mxu0 %v3018_v41 }
  0xa4   :  { %2817 = vmatpush1.bf16.msra.mxu0 %v2816_v59 }
  0xa5   :  { %2818 = vmatprep.subr.bf16.mxu0 %v3018_v41 }
  0xa8   :  { %2820 = vmatpush1.bf16.msra.mxu0 %v2819_v62 }
  0xa9   :  { %2821 = vmatprep.subr.bf16.mxu0 %v3018_v41 }
  0xac   :  { %2823 = vmatpush1.bf16.msra.mxu0 %v2822_v1 }
  0xad   :  { %2824 = vmatprep.subr.bf16.mxu0 %v3018_v41 }
  0xb0   :  { %2826 = vmatpush1.bf16.msra.mxu0 %v2825_v4 }
  0xb1   :  { %2827 = vmatprep.subr.bf16.mxu0 %v3018_v41 }
  0xb4   :  { %2829 = vmatpush1.bf16.msra.mxu0 %v2828_v7 }
  0xb5   :  { %2830 = vmatprep.subr.bf16.mxu0 %v3018_v41 }
  0xb8   :  { %2832 = vmatpush1.bf16.msra.mxu0 %v2831_v10 }
  0xbb   :  { %612 = vmatmul.mubr.f32.vlgmr.msra.gmra.mrb[4].mxu0 %v3084_v31 }
 0x12e   :  { %v3097_v11 = vpop.f32.mrb[0].mxu0  ;;  %v3101_v14 = vpop.f32.mrb[0].mxu1 }
 0x12f   :  { %v617_v12 = vand.u32 2147483647, %v3097_v11  ;;  %v620_v13 = vand.u32 2139095040, %v3097_v11  ;;  %v3103_v15 = vpop.f32.mrb[1].mxu0  ;;  %v825_v16 = vand.u32 2147483647, %v3101_v14 }
 0x130   :  { %v828_v17 = vand.u32 2139095040, %v3101_v14  ;;  %v3107_v18 = vpop.f32.mrb[1].mxu1  ;;  %v724_v22 = vand.u32 2139095040, %v3103_v15  ;;  %v721_v36 = vand.u32 2147483647, %v3103_v15  ;;  %vm619_vm14 = vcmp.lt.s32.totalorder %v3097_v11, 0 }
 0x131   :  { %v621_v19 = vshrl.u32 %v620_v13, 23  ;;  %v624_v31 = vand.u32 8388607, %v617_v12  ;;  %v832_v21 = vand.u32 8388607, %v825_v16 }
 0x132   :  { %v829_v20 = vshrl.u32 %v828_v17, 23  ;;  %v725_v25 = vshrl.u32 %v724_v22, 23  ;;  %vm3219_vm15 = vcmp.le.f32.partialorder %v617_v12, 0.7853982 }
 0x133   :  { %v2533_v23 = vadd.s32 4294967169, %v621_v19  ;;  %v625_v27 = vor.u32 8388608, %v624_v31  ;;  %v833_v28 = vor.u32 8388608, %v832_v21 }
 0x134   :  { %v2541_v24 = vadd.s32 4294967169, %v829_v20  ;;  %v2537_v30 = vadd.s32 4294967169, %v725_v25 }
 0x135   :  { %v627_v26 = vadd.s32 1, %v2533_v23  ;;  %v3115_v37 = vshll.u32 %v625_v27, 8  ;;  %v3119_v39 = vshll.u32 %v833_v28, 8 }
 0x136   :  { %v835_v29 = vadd.s32 1, %v2541_v24  ;;  %v3121_v40 = vadd.s32 1, %v2537_v30 }
 0x137   :  { %vm628_vm1 = vcmp.gt.s32.totalorder %v627_v26, 0 }
 0x138   :  { %v629_v32 = vsel %vm628_vm1, %v627_v26, 0  ;;  %vm836_vm2 = vcmp.gt.s32.totalorder %v835_v29, 0  ;;  %vm732_vm7 = vcmp.gt.s32.totalorder %v3121_v40, 0 }
 0x139   :  { %v630_v33 = vshrl.u32 %v629_v32, 5  ;;  %v631_v34 = vand.u32 31, %v629_v32  ;;  %v837_v35 = vsel %vm836_vm2, %v835_v29, 0 }
 0x13a   :  { %v3117_v38 = vshrl.u32 %v837_v35, 5  ;;  %v839_v46 = vand.u32 31, %v837_v35 }
 0x13b   :  { %v632_v41 = vsub.s32 32, %v631_v34  ;;  %v634_v43 = vshll.u32 %v3019_v42, %v631_v34  ;;  %v637_v45 = vshll.u32 %v3020_v44, %v631_v34  ;;  %v640_v49 = vshll.u32 %v3021_v48, %v631_v34 }
 0x13c   :  { %v643_v51 = vshll.u32 %v3022_v50, %v631_v34  ;;  %v646_v53 = vshll.u32 %v3023_v52, %v631_v34  ;;  %vm649_vm3 = vcmp.lt.s32.totalorder %v630_v33, 1  ;;  %vm650_vm4 = vcmp.lt.s32.totalorder %v630_v33, 2 }
 0x13d   :  { %v635_v54 = vshrl.u32 %v3020_v44, %v632_v41  ;;  %v638_v55 = vshrl.u32 %v3021_v48, %v632_v41  ;;  %v641_v56 = vshrl.u32 %v3022_v50, %v632_v41  ;;  %v633_v57 = vshrl.u32 %v3019_v42, %v632_v41 }
 0x13e   :  { %v644_v58 = vshrl.u32 %v3023_v52, %v632_v41  ;;  %v647_v59 = vshrl.u32 %v3024_v47, %v632_v41  ;;  %vm651_vm5 = vcmp.lt.s32.totalorder %v630_v33, 3  ;;  %v840_v63 = vsub.s32 32, %v839_v46 }
 0x13f   :  { %v636_v60 = vor.u32 %v635_v54, %v634_v43  ;;  %v639_v61 = vor.u32 %v638_v55, %v637_v45  ;;  %v642_v62 = vor.u32 %v641_v56, %v640_v49  ;;  %vm652_vm6 = vcmp.lt.s32.totalorder %v630_v33, 4 }
 0x140   :  { %v645_v0 = vor.u32 %v644_v58, %v643_v51  ;;  %v648_v1 = vor.u32 %v647_v59, %v646_v53  ;;  %v842_v2 = vshll.u32 %v3019_v42, %v839_v46  ;;  %v845_v10 = vshll.u32 %v3020_v44, %v839_v46 }
 0x141   :  { %v653_v3 = vsel %vm649_vm3, %v633_v57, %v636_v60  ;;  %v654_v4 = vsel %vm652_vm6, %v642_v62, 2102212464  ;;  %v657_v5 = vsel %vm649_vm3, %v636_v60, %v639_v61  ;;  %v661_v6 = vsel %vm649_vm3, %v639_v61, %v642_v62 }
 0x142   :  { %v655_v7 = vsel %vm651_vm5, %v639_v61, %v654_v4  ;;  %v658_v8 = vsel %vm652_vm6, %v645_v0, 920167782  ;;  %v662_v9 = vsel %vm652_vm6, %v648_v1, 1326507024  ;;  %v841_v19 = vshrl.u32 %v3019_v42, %v840_v63 }
 0x143   :  { %v659_v13 = vsel %vm651_vm5, %v642_v62, %v658_v8  ;;  %v663_v17 = vsel %vm651_vm5, %v645_v0, %v662_v9  ;;  %v843_v31 = vshrl.u32 %v3020_v44, %v840_v63  ;;  %v656_v20 = vsel %vm650_vm4, %v653_v3, %v655_v7 }
 0x144   :  { %v660_v21 = vsel %vm650_vm4, %v657_v5, %v659_v13  ;;  %v664_v22 = vsel %vm650_vm4, %v661_v6, %v663_v17  ;;  %v846_v23 = vshrl.u32 %v3021_v48, %v840_v63  ;;  %v848_v30 = vshll.u32 %v3021_v48, %v839_v46 }
 0x145   :  { %v3150_v24 = vmul.u32.u64.low %v3115_v37, %v664_v22  ;;  %v3151_v25 = vmul.u32.u64.high %v3115_v37, %v664_v22, %v3150_v24  ;;  %v3154_v26 = vmul.u32.u64.low %v3115_v37, %v660_v21  ;;  %v3155_v27 = vmul.u32.u64.high %v3115_v37, %v660_v21, %v3154_v26 }
 0x146   :  { %v844_v28 = vor.u32 %v843_v31, %v842_v2  ;;  %v847_v29 = vor.u32 %v846_v23, %v845_v10  ;;  %v849_v32 = vshrl.u32 %v3022_v50, %v840_v63  ;;  %v851_v33 = vshll.u32 %v3022_v50, %v839_v46 }
 0x147   :  { %v852_v34 = vshrl.u32 %v3023_v52, %v840_v63  ;;  %v854_v35 = vshll.u32 %v3023_v52, %v839_v46  ;;  %v855_v41 = vshrl.u32 %v3024_v47, %v840_v63  ;;  %v672_v43 = vmul.u32 %v3115_v37, %v656_v20 }
 0x148   :  { %v850_v45 = vor.u32 %v849_v32, %v848_v30  ;;  %vm857_vm8 = vcmp.lt.s32.totalorder %v3117_v38, 1  ;;  %vm858_vm9 = vcmp.lt.s32.totalorder %v3117_v38, 2  ;;  %vm674_vm10 = vc.u32 %v3151_v25, %v3154_v26 }
 0x149   :  { %v675_v49 = vadd.s32 1, %v3155_v27  ;;  %v853_v51 = vor.u32 %v852_v34, %v851_v33  ;;  %vm859_vm11 = vcmp.lt.s32.totalorder %v3117_v38, 3  ;;  %v856_v53 = vor.u32 %v855_v41, %v854_v35 }
 0x14a   :  { %vm860_vm12 = vcmp.lt.s32.totalorder %v3117_v38, 4  ;;  %v861_v46 = vsel %vm857_vm8, %v841_v19, %v844_v28  ;;  %v865_v54 = vsel %vm857_vm8, %v844_v28, %v847_v29  ;;  %v869_v57 = vsel %vm857_vm8, %v847_v29, %v850_v45 }
 0x14b   :  { %v676_v37 = vsel %vm674_vm10, %v675_v49, %v3155_v27  ;;  %v862_v55 = vsel %vm860_vm12, %v850_v45, 2102212464  ;;  %v866_v56 = vsel %vm860_vm12, %v853_v51, 920167782  ;;  %v870_v61 = vsel %vm860_vm12, %v856_v53, 1326507024 }
 0x14c   :  { %v677_v58 = vadd.s32 %v676_v37, %v672_v43  ;;  %v863_v59 = vsel %vm859_vm11, %v847_v29, %v862_v55  ;;  %v867_v60 = vsel %vm859_vm11, %v850_v45, %v866_v56  ;;  %v871_v0 = vsel %vm859_vm11, %v853_v51, %v870_v61 }
 0x14d   :  { %v864_v62 = vsel %vm858_vm9, %v861_v46, %v863_v59  ;;  %v868_v63 = vsel %vm858_vm9, %v865_v54, %v867_v60  ;;  %v733_v1 = vsel %vm732_vm7, %v3121_v40, 0  ;;  %v872_v3 = vsel %vm858_vm9, %v869_v57, %v871_v0 }
 0x14e   :  { %v678_v2 = vadd.s32 536870912, %v677_v58  ;;  %v3183_v4 = vmul.u32.u64.low %v3119_v39, %v868_v63  ;;  %v3184_v5 = vmul.u32.u64.high %v3119_v39, %v868_v63, %v3183_v4  ;;  %v735_v9 = vand.u32 31, %v733_v1 }
 0x14f   :  { %v3188_v6 = vmul.u32.u64.low %v3119_v39, %v872_v3  ;;  %v3189_v7 = vmul.u32.u64.high %v3119_v39, %v872_v3, %v3188_v6  ;;  %v880_v10 = vmul.u32 %v3119_v39, %v864_v62  ;;  %v728_v40 = vand.u32 8388607, %v721_v36 }
 0x150   :  { %v679_v8 = vshrl.u32 %v678_v2, 30  ;;  %v883_v38 = vadd.s32 1, %v3184_v5  ;;  %v932_v17 = vand.u32 2139095040, %v3107_v18  ;;  %v736_v19 = vsub.s32 32, %v735_v9 }
 0x151   :  { %vm882_vm13 = vc.u32 %v3189_v7, %v3183_v4  ;;  %v729_v22 = vor.u32 8388608, %v728_v40  ;;  %v3203_v27 = vshrl.u32 %v733_v1, 5  ;;  %v744_v32 = vshll.u32 %v3021_v48, %v735_v9 }
 0x152   :  { %v680_v13 = vshll.u32 %v679_v8, 30  ;;  %v884_v20 = vsel %vm882_vm13, %v883_v38, %v3184_v5  ;;  %v933_v23 = vshrl.u32 %v932_v17, 23  ;;  %v745_v28 = vshrl.u32 %v3022_v50, %v736_v19 }
 0x153   :  { %v885_v21 = vadd.s32 %v884_v20, %v880_v10  ;;  %v739_v30 = vshrl.u32 %v3020_v44, %v736_v19  ;;  %v929_v33 = vand.u32 2147483647, %v3107_v18  ;;  %v673_v34 = vadd.s32 %v3154_v26, %v3151_v25 }
 0x154   :  { %v3198_v31 = vsub.s32 %v677_v58, %v680_v13  ;;  %v742_v41 = vshrl.u32 %v3021_v48, %v736_v19  ;;  %v3215_v43 = vshll.u32 %v729_v22, 8  ;;  %v738_v51 = vshll.u32 %v3019_v42, %v735_v9 }
 0x155   :  { %v886_v24 = vadd.s32 536870912, %v885_v21  ;;  %v746_v53 = vor.u32 %v745_v28, %v744_v32  ;;  %v2545_v46 = vadd.s32 4294967169, %v933_v23  ;;  %v741_v25 = vshll.u32 %v3020_v44, %v735_v9 }
 0x156   :  { %v683_v39 = vsub.s32 0, %v3198_v31  ;;  %v748_v26 = vshrl.u32 %v3023_v52, %v736_v19  ;;  %vm753_vm0 = vcmp.lt.s32.totalorder %v3203_v27, 1  ;;  %v703_v55 = vsub.s32 4, %v679_v8 }
 0x157   :  { %v3212_v35 = vshrl.u32 %v886_v24, 30  ;;  %v740_v56 = vor.u32 %v739_v30, %v738_v51  ;;  %v747_v12 = vshll.u32 %v3022_v50, %v735_v9  ;;  %vm754_vm1 = vcmp.lt.s32.totalorder %v3203_v27, 2 }
 0x158   :  { %v2534_v29 = vmin.u32 %v683_v39, %v3198_v31  ;;  %v743_v58 = vor.u32 %v742_v41, %v741_v25  ;;  %v751_v59 = vshrl.u32 %v3024_v47, %v736_v19  ;;  %vm756_vm2 = vcmp.lt.s32.totalorder %v3203_v27, 4 }
 0x159   :  { %v888_v54 = vshll.u32 %v3212_v35, 30  ;;  %v737_v60 = vshrl.u32 %v3019_v42, %v736_v19  ;;  %v749_v61 = vor.u32 %v748_v26, %v747_v12  ;;  %v758_v62 = vsel %vm756_vm2, %v746_v53, 2102212464 }
 0x15a   :  { %v685_v49 = vclz %v2534_v29  ;;  %v750_v2 = vshll.u32 %v3023_v52, %v735_v9  ;;  %vm755_vm4 = vcmp.lt.s32.totalorder %v3203_v27, 3  ;;  %v704_v40 = vsel %vm619_vm14, %v703_v55, %v679_v8 }
 0x15b   :  { %v3230_v57 = vsub.s32 %v885_v21, %v888_v54  ;;  %v757_v13 = vsel %vm753_vm0, %v737_v60, %v740_v56  ;;  %v759_v20 = vsel %vm755_vm4, %v743_v58, %v758_v62  ;;  %vm827_vm5 = vcmp.lt.s32.totalorder %v3101_v14, 0 }
 0x15c   :  { %v2535_v37 = vadd.s32 4294967294, %v685_v49  ;;  %v752_v19 = vor.u32 %v751_v59, %v750_v2  ;;  %v761_v8 = vsel %vm753_vm0, %v740_v56, %v743_v58  ;;  %v762_v39 = vsel %vm756_vm2, %v749_v61, 920167782 }
 0x15d   :  { %v891_v1 = vsub.s32 0, %v3230_v57  ;;  %v706_v23 = vsel %vm3219_vm15, 0, %v704_v40  ;;  %v911_v28 = vsub.s32 4, %v3212_v35  ;;  %v763_v32 = vsel %vm755_vm4, %v746_v53, %v762_v39 }
 0x15e   :  { %vm2536_vm3 = vcmp.lt.s32.totalorder %v2535_v37, 0  ;;  %v3237_v63 = vpop.f32.mrb[2].mxu0  ;;  %v3242_v3 = vpop.f32.mrb[2].mxu1  ;;  %v760_v49 = vsel %vm754_vm1, %v757_v13, %v759_v20  ;;  %v764_v51 = vsel %vm754_vm1, %v761_v8, %v763_v32  ;;  %v939_v26 = vadd.s32 1, %v2545_v46 }
 0x15f   :  { %v688_v0 = vsel %vm2536_vm3, 0, %v2535_v37  ;;  %v3244_v5 = vpop.f32.mrb[3].mxu0  ;;  %v3250_v38 = vpop.f32.mrb[3].mxu1  ;;  %v2542_v9 = vmin.u32 %v891_v1, %v3230_v57  ;;  %v3281_v37 = vmul.u32.u64.low %v3215_v43, %v764_v51  ;;  %v3282_v55 = vmul.u32.u64.high %v3215_v43, %v764_v51, %v3281_v37 }
 0x160   :  { %v689_v6 = vsub.s32 32, %v688_v0  ;;  %v693_v10 = vsub.s32 4294967266, %v688_v0  ;;  %v690_v17 = vshll.u32 %v3198_v31, %v688_v0  ;;  %v881_v31 = vadd.s32 %v3183_v4, %v3189_v7 }
 0x161   :  { %v893_v24 = vclz %v2542_v9  ;;  %v766_v4 = vsel %vm756_vm2, %v752_v19, 1326507024  ;;  %vm940_vm7 = vcmp.gt.s32.totalorder %v939_v26, 0  ;;  %vm3292_vm8 = vcmp.le.f32.partialorder %v825_v16, 0.7853982 }
 0x162   :  { %v691_v21 = vshrl.u32 %v673_v34, %v689_v6  ;;  %v694_v22 = vadd.s32 127, %v693_v10  ;;  %v765_v34 = vsel %vm753_vm0, %v743_v58, %v746_v53  ;;  %v767_v25 = vsel %vm755_vm4, %v749_v61, %v766_v4 }
 0x163   :  { %v2543_v41 = vadd.s32 4294967294, %v893_v24  ;;  %v768_v53 = vsel %vm754_vm1, %v765_v34, %v767_v25  ;;  %v3298_v0 = vand.u32 8388607, %v929_v33  ;;  %v941_v1 = vsel %vm940_vm7, %v939_v26, 0 }
 0x164   :  { %v692_v29 = vor.u32 %v691_v21, %v690_v17  ;;  %v695_v30 = vshll.u32 %v694_v22, 23  ;;  %v3286_v58 = vmul.u32.u64.low %v3215_v43, %v768_v53  ;;  %v3287_v59 = vmul.u32.u64.high %v3215_v43, %v768_v53, %v3286_v58 }
 0x165   :  { %vm2544_vm6 = vcmp.lt.s32.totalorder %v2543_v41, 0  ;;  %v710_v2 = vadd.s32 3, %v706_v23  ;;  %v779_v40 = vadd.s32 1, %v3282_v55  ;;  %v776_v13 = vmul.u32 %v3215_v43, %v760_v49 }
 0x166   :  { %v696_v7 = vor.u32 4788187, %v695_v30  ;;  %v699_v54 = vcvt.s32.f32 %v692_v29  ;;  %v896_v12 = vsel %vm2544_vm6, 0, %v2543_v41  ;;  %vm778_vm9 = vc.u32 %v3287_v59, %v3281_v37 }
 0x167   :  { %v897_v60 = vsub.s32 32, %v896_v12  ;;  %v898_v62 = vshll.u32 %v3230_v57, %v896_v12  ;;  %v901_v61 = vsub.s32 4294967266, %v896_v12  ;;  %v943_v16 = vand.u32 31, %v941_v1 }
 0x168   :  { %v697_v56 = vand.u32 2147483647, %v696_v7  ;;  %v912_v19 = vsel %vm827_vm5, %v911_v28, %v3212_v35  ;;  %v780_v20 = vsel %vm778_vm9, %v779_v40, %v3282_v55  ;;  %v3310_v22 = vand.u32 3, %v706_v23 }
 0x169   :  { %v899_v6 = vshrl.u32 %v881_v31, %v897_v60  ;;  %v902_v10 = vadd.s32 127, %v901_v61  ;;  %v781_v8 = vadd.s32 %v780_v20, %v776_v13  ;;  %v944_v39 = vsub.s32 32, %v943_v16 }
 0x16a   :  { %v700_v46 = vmul.f32 %v699_v54, %v697_v56  ;;  %v3315_v31 = vand.u32 3, %v710_v2  ;;  %v914_v35 = vsel %vm3292_vm8, 0, %v912_v19  ;;  %v3319_v30 = vshrl.u32 %v941_v1, 5 }
 0x16b   :  { %v900_v17 = vor.u32 %v899_v6, %v898_v62  ;;  %v903_v9 = vshll.u32 %v902_v10, 23  ;;  %v782_v28 = vadd.s32 536870912, %v781_v8  ;;  %v946_v32 = vshll.u32 %v3019_v42, %v943_v16 }
 0x16c   :  { %v701_v57 = vxor.u32 2147483648, %v700_v46  ;;  %v949_v34 = vshll.u32 %v3020_v44, %v943_v16  ;;  %v947_v45 = vshrl.u32 %v3020_v44, %v944_v39  ;;  %v950_v49 = vshrl.u32 %v3021_v48, %v944_v39 }
 0x16d   :  { %v904_v24 = vor.u32 4788187, %v903_v9  ;;  %v907_v29 = vcvt.s32.f32 %v900_v17  ;;  %v3323_v41 = vshrl.u32 %v782_v28, 30  ;;  %v955_v51 = vshll.u32 %v3022_v50, %v943_v16 }
 0x16e   :  { %v702_v21 = vsel %vm619_vm14, %v701_v57, %v700_v46  ;;  %v937_v7 = vor.u32 8388608, %v3298_v0  ;;  %v956_v54 = vshrl.u32 %v3023_v52, %v944_v39  ;;  %vm1660_vm10 = vcmp.eq.s32.totalorder %v3310_v22, 2 }
 0x16f   :  { %v705_v43 = vsel %vm3219_vm15, %v3097_v11, %v702_v21  ;;  %v905_v23 = vand.u32 2147483647, %v904_v24  ;;  %v784_v25 = vshll.u32 %v3323_v41, 30  ;;  %v952_v26 = vshll.u32 %v3021_v48, %v943_v16 }
 0x170   :  { %2882 = vcosq.f32 %v705_v43  ;;  %v953_v53 = vshrl.u32 %v3022_v50, %v944_v39  ;;  %vm713_vm11 = vcmp.eq.s32.totalorder %v3315_v31, 0  ;;  %vm716_vm12 = vcmp.eq.s32.totalorder %v3315_v31, 2 }
 0x171   :  { %2884 = vsinq.f32 %v705_v43  ;;  %v908_v4 = vmul.f32 %v907_v29, %v905_v23  ;;  %vm1657_vm13 = vcmp.eq.s32.totalorder %v3310_v22, 0  ;;  %v918_v56 = vadd.s32 3, %v914_v35 }
 0x172   :  { %vm961_vm14 = vcmp.lt.s32.totalorder %v3319_v30, 1  ;;  %vm712_vm15 = vcmp.lt.s32.totalorder %v3315_v31, 2  ;;  %vm1656_vm0 = vcmp.lt.s32.totalorder %v3310_v22, 2  ;;  %v3340_v12 = vsub.s32 %v781_v8, %v784_v25 }
 0x173   :  { %v909_v55 = vxor.u32 2147483648, %v908_v4  ;;  %v948_v58 = vor.u32 %v947_v45, %v946_v32  ;;  %v951_v60 = vor.u32 %v950_v49, %v949_v34  ;;  %v957_v62 = vor.u32 %v956_v54, %v955_v51 }
 0x174   :  { %vm709_vm1 = vweird.f32 %v3097_v11  ;;  %v958_v46 = vshll.u32 %v3023_v52, %v943_v16  ;;  %v959_v0 = vshrl.u32 %v3024_v47, %v944_v39  ;;  %vm964_vm2 = vcmp.lt.s32.totalorder %v3319_v30, 4 }
 0x175   :  { %v910_v61 = vsel %vm827_vm5, %v909_v55, %v908_v4  ;;  %v787_v2 = vsub.s32 0, %v3340_v12  ;;  %v945_v6 = vshrl.u32 %v3019_v42, %v944_v39  ;;  %v954_v10 = vor.u32 %v953_v53, %v952_v26 }
 0x176   :  { %v913_v1 = vsel %vm3292_vm8, %v3101_v14, %v910_v61  ;;  %v3353_v40 = vand.u32 3, %v918_v56  ;;  %v3355_v57 = vand.u32 3, %v914_v35  ;;  %vm963_vm3 = vcmp.lt.s32.totalorder %v3319_v30, 3 }
 0x177   :  { %2886 = vcosq.f32 %v913_v1  ;;  %v2538_v16 = vmin.u32 %v787_v2, %v3340_v12  ;;  %v966_v27 = vsel %vm964_vm2, %v954_v10, 2102212464  ;;  %v970_v17 = vsel %vm964_vm2, %v957_v62, 920167782 }
 0x178   :  { %2888 = vsinq.f32 %v913_v1  ;;  %v960_v20 = vor.u32 %v959_v0, %v958_v46  ;;  %vm962_vm4 = vcmp.lt.s32.totalorder %v3319_v30, 2  ;;  %v969_v21 = vsel %vm961_vm14, %v948_v58, %v951_v60 }
 0x179   :  { %v789_v39 = vclz %v2538_v16  ;;  %v965_v43 = vsel %vm961_vm14, %v945_v6, %v948_v58  ;;  %v3368_v24 = vshll.u32 %v937_v7, 8  ;;  %vm1866_vm5 = vcmp.eq.s32.totalorder %v3355_v57, 2 }
 0x17a   :  { %v2883_v13 = vpop.eup %2882  ;;  %v967_v28 = vsel %vm963_vm3, %v951_v60, %v966_v27  ;;  %v971_v23 = vsel %vm963_vm3, %v954_v10, %v970_v17  ;;  %vm921_vm6 = vcmp.eq.s32.totalorder %v3353_v40, 0  ;;  %vm1863_vm7 = vcmp.eq.s32.totalorder %v3355_v57, 0 }
 0x17b   :  { %v2885_v9 = vpop.eup %2884  ;;  %v717_v19 = vxor.u32 2147483648, %v2883_v13  ;;  %vm723_vm8 = vcmp.lt.s32.totalorder %v3103_v15, 0  ;;  %v2539_v45 = vadd.s32 4294967294, %v789_v39  ;;  %v972_v49 = vsel %vm962_vm4, %v969_v21, %v971_v23 }
 0x17c   :  { %v714_v8 = vxor.u32 2147483648, %v2885_v9  ;;  %vm920_vm9 = vcmp.lt.s32.totalorder %v3353_v40, 2  ;;  %v973_v7 = vsel %vm961_vm14, %v951_v60, %v954_v10  ;;  %v974_v54 = vsel %vm964_vm2, %v960_v20, 1326507024 }
 0x17d   :  { %v718_v29 = vsel %vm716_vm12, %v717_v19, %v2885_v9  ;;  %v1662_v35 = vsel %vm1660_vm10, %v717_v19, %v2885_v9  ;;  %vm1862_vm10 = vcmp.lt.s32.totalorder %v3355_v57, 2  ;;  %vm2540_vm12 = vcmp.lt.s32.totalorder %v2539_v45, 0 }
 0x17e   :  { %v715_v32 = vsel %vm713_vm11, %v2883_v13, %v714_v8  ;;  %v1659_v34 = vsel %vm1657_vm13, %v2883_v13, %v714_v8  ;;  %vm917_vm11 = vweird.f32 %v3101_v14  ;;  %v975_v22 = vsel %vm963_vm3, %v957_v62, %v974_v54 }
 0x17f   :  { %v719_v51 = vsel %vm712_vm15, %v715_v32, %v718_v29  ;;  %v1663_v4 = vsel %vm1656_vm0, %v1659_v34, %v1662_v35  ;;  %v792_v26 = vsel %vm2540_vm12, 0, %v2539_v45  ;;  %v976_v53 = vsel %vm962_vm4, %v973_v7, %v975_v22 }
 0x180   :  { %v720_v25 = vsel %vm709_vm1, nan, %v719_v51  ;;  %v1664_v31 = vsel %vm709_vm1, nan, %v1663_v4  ;;  %v3408_v55 = vmul.u32.u64.low %v3368_v24, %v972_v49  ;;  %v3409_v56 = vmul.u32.u64.high %v3368_v24, %v972_v49, %v3408_v55 }
 0x181   :  { %1553 = vst [vmem:[#allocation7] sm:$0xff] %v720_v25  ;;  %2489 = vst [vmem:[#allocation8] sm:$0xff] %v1664_v31  ;;  %v777_v11 = vadd.s32 %v3281_v37, %v3287_v59  ;;  %v793_v58 = vsub.s32 32, %v792_v26  ;;  %v797_v60 = vsub.s32 4294967266, %v792_v26  ;;  %v968_v61 = vsel %vm962_vm4, %v965_v43, %v967_v28  ;;  %v2887_v62 = vpop.eup %2886 }
 0x182   :  { %vm924_vm13 = vcmp.eq.s32.totalorder %v3353_v40, 2  ;;  %v807_v46 = vsub.s32 4, %v3323_v41  ;;  %v3419_v0 = vmul.u32.u64.low %v3368_v24, %v976_v53  ;;  %v3420_v1 = vmul.u32.u64.high %v3368_v24, %v976_v53, %v3419_v0  ;;  %v2889_v2 = vpop.eup %2888 }
 0x183   :  { %v925_v6 = vxor.u32 2147483648, %v2887_v62  ;;  %v794_v10 = vshll.u32 %v3340_v12, %v792_v26  ;;  %v795_v13 = vshrl.u32 %v777_v11, %v793_v58  ;;  %v798_v37 = vadd.s32 127, %v797_v60 }
 0x184   :  { %v922_v59 = vxor.u32 2147483648, %v2889_v2  ;;  %v984_v16 = vmul.u32 %v3368_v24, %v968_v61  ;;  %v987_v30 = vadd.s32 1, %v3409_v56  ;;  %v1036_v27 = vand.u32 2139095040, %v3237_v63 }
 0x185   :  { %v926_v17 = vsel %vm924_vm13, %v925_v6, %v2889_v2  ;;  %v1868_v9 = vsel %vm1866_vm5, %v925_v6, %v2889_v2  ;;  %v796_v19 = vor.u32 %v795_v13, %v794_v10  ;;  %v799_v20 = vshll.u32 %v798_v37, 23 }
 0x186   :  { %v923_v21 = vsel %vm921_vm6, %v2887_v62, %v922_v59  ;;  %v1865_v12 = vsel %vm1863_vm7, %v2887_v62, %v922_v59  ;;  %v808_v8 = vsel %vm723_vm8, %v807_v46, %v3323_v41  ;;  %vm986_vm14 = vc.u32 %v3420_v1, %v3408_v55 }
 0x187   :  { %v927_v39 = vsel %vm920_vm9, %v923_v21, %v926_v17  ;;  %v1869_v43 = vsel %vm1862_vm10, %v1865_v12, %v1868_v9  ;;  %v800_v24 = vor.u32 4788187, %v799_v20  ;;  %v1033_v29 = vand.u32 2147483647, %v3237_v63 }
 0x188   :  { %v928_v35 = vsel %vm917_vm11, nan, %v927_v39  ;;  %v1870_v28 = vsel %vm917_vm11, nan, %v1869_v43  ;;  %v988_v41 = vsel %vm986_vm14, %v987_v30, %v3409_v56  ;;  %v1037_v23 = vshrl.u32 %v1036_v27, 23 }
 0x189   :  { %1555 = vst [vmem:[#allocation7 + $0x10] sm:$0xff] %v928_v35  ;;  %2491 = vst [vmem:[#allocation8 + $0x10] sm:$0xff] %v1870_v28  ;;  %vm3449_vm15 = vcmp.le.f32.partialorder %v721_v36, 0.7853982  ;;  %v801_v57 = vand.u32 2147483647, %v800_v24  ;;  %v803_v32 = vcvt.s32.f32 %v796_v19  ;;  %v989_v34 = vadd.s32 %v988_v41, %v984_v16 }
 0x18a   :  { %v810_v45 = vsel %vm3449_vm15, 0, %v808_v8  ;;  %v2549_v49 = vadd.s32 4294967169, %v1037_v23  ;;  %v1244_v14 = vand.u32 2139095040, %v3242_v3  ;;  %v1040_v7 = vand.u32 8388607, %v1033_v29 }
 0x18b   :  { %v804_v51 = vmul.f32 %v803_v32, %v801_v57  ;;  %v990_v4 = vadd.s32 536870912, %v989_v34  ;;  %v814_v36 = vadd.s32 3, %v810_v45  ;;  %v1241_v22 = vand.u32 2147483647, %v3242_v3 }
 0x18c   :  { %v1043_v54 = vadd.s32 1, %v2549_v49  ;;  %v1245_v53 = vshrl.u32 %v1244_v14, 23  ;;  %v3466_v62 = vand.u32 3, %v810_v45  ;;  %v1041_v46 = vor.u32 8388608, %v1040_v7 }
 0x18d   :  { %v805_v25 = vxor.u32 2147483648, %v804_v51  ;;  %v991_v31 = vshrl.u32 %v990_v4, 30  ;;  %v3468_v2 = vand.u32 3, %v814_v36  ;;  %v3474_v10 = vand.u32 8388607, %v1241_v22 }
 0x18e   :  { %v3459_v26 = vpop.f32.mrb[4].mxu0  ;;  %vm1044_vm0 = vcmp.gt.s32.totalorder %v1043_v54, 0  ;;  %v2557_v37 = vadd.s32 4294967169, %v1245_v53  ;;  %vm931_vm1 = vcmp.lt.s32.totalorder %v3107_v18, 0  ;;  %v985_v30 = vadd.s32 %v3408_v55, %v3420_v1 }
 0x18f   :  { %v615_v56 = vpop.f32.mrb[5].mxu0  ;;  %v806_v11 = vsel %vm723_vm8, %v805_v25, %v804_v51  ;;  %v992_v58 = vshll.u32 %v991_v31, 30  ;;  %v1045_v60 = vsel %vm1044_vm0, %v1043_v54, 0  ;;  %v1015_v16 = vsub.s32 4, %v991_v31 }
 0x190   :  { %v809_v61 = vsel %vm3449_vm15, %v3103_v15, %v806_v11  ;;  %v1047_v0 = vand.u32 31, %v1045_v60  ;;  %v3482_v9 = vshll.u32 %v1041_v46, 8  ;;  %vm820_vm2 = vcmp.eq.s32.totalorder %v3468_v2, 2 }
 0x191   :  { %2890 = vcosq.f32 %v809_v61  ;;  %v3470_v6 = vsub.s32 %v989_v34, %v992_v58  ;;  %vm1763_vm3 = vcmp.eq.s32.totalorder %v3466_v62, 2  ;;  %v3487_v20 = vshrl.u32 %v1045_v60, 5 }
 0x192   :  { %2892 = vsinq.f32 %v809_v61  ;;  %v1048_v13 = vsub.s32 32, %v1047_v0  ;;  %v1050_v21 = vshll.u32 %v3019_v42, %v1047_v0  ;;  %v1249_v12 = vor.u32 8388608, %v3474_v10 }
 0x193   :  { %v995_v59 = vsub.s32 0, %v3470_v6  ;;  %vm817_vm4 = vcmp.eq.s32.totalorder %v3468_v2, 0  ;;  %vm1760_vm5 = vcmp.eq.s32.totalorder %v3466_v62, 0  ;;  %v1053_v55 = vshll.u32 %v3020_v44, %v1047_v0 }
 0x194   :  { %v1051_v27 = vshrl.u32 %v3020_v44, %v1048_v13  ;;  %v1054_v17 = vshrl.u32 %v3021_v48, %v1048_v13  ;;  %v1056_v1 = vshll.u32 %v3021_v48, %v1047_v0  ;;  %v1057_v8 = vshrl.u32 %v3022_v50, %v1048_v13 }
 0x195   :  { %v2546_v19 = vmin.u32 %v995_v59, %v3470_v6  ;;  %v3496_v39 = vadd.s32 1, %v2557_v37  ;;  %vm816_vm6 = vcmp.lt.s32.totalorder %v3468_v2, 2  ;;  %vm1759_vm7 = vcmp.lt.s32.totalorder %v3466_v62, 2 }
 0x196   :  { %v1016_v24 = vsel %vm931_vm1, %v1015_v16, %v991_v31  ;;  %v1049_v35 = vshrl.u32 %v3019_v42, %v1048_v13  ;;  %v1052_v28 = vor.u32 %v1051_v27, %v1050_v21  ;;  %vm813_vm8 = vweird.f32 %v3103_v15 }
 0x197   :  { %v997_v43 = vclz %v2546_v19  ;;  %v1055_v41 = vor.u32 %v1054_v17, %v1053_v55  ;;  %v1058_v23 = vor.u32 %v1057_v8, %v1056_v1  ;;  %v1059_v40 = vshll.u32 %v3022_v50, %v1047_v0 }
 0x198   :  { %v1060_v57 = vshrl.u32 %v3023_v52, %v1048_v13  ;;  %vm3508_vm9 = vcmp.le.f32.partialorder %v929_v33, 0.7853982  ;;  %v1062_v45 = vshll.u32 %v3023_v52, %v1047_v0  ;;  %v1063_v49 = vshrl.u32 %v3024_v47, %v1048_v13 }
 0x199   :  { %v2547_v34 = vadd.s32 4294967294, %v997_v43  ;;  %vm1065_vm10 = vcmp.lt.s32.totalorder %v3487_v20, 1  ;;  %vm1066_vm11 = vcmp.lt.s32.totalorder %v3487_v20, 2  ;;  %vm1067_vm12 = vcmp.lt.s32.totalorder %v3487_v20, 3 }
 0x19a   :  { %v1061_v14 = vor.u32 %v1060_v57, %v1059_v40  ;;  %vm1068_vm13 = vcmp.lt.s32.totalorder %v3487_v20, 4  ;;  %v1064_v33 = vor.u32 %v1063_v49, %v1062_v45  ;;  %v1069_v4 = vsel %vm1065_vm10, %v1049_v35, %v1052_v28 }
 0x19b   :  { %v2891_v51 = vpop.eup %2890  ;;  %vm2548_vm14 = vcmp.lt.s32.totalorder %v2547_v34, 0  ;;  %v1070_v7 = vsel %vm1068_vm13, %v1058_v23, 2102212464  ;;  %v1073_v31 = vsel %vm1065_vm10, %v1052_v28, %v1055_v41  ;;  %v1077_v21 = vsel %vm1065_vm10, %v1055_v41, %v1058_v23 }
 0x19c   :  { %v2893_v54 = vpop.eup %2892  ;;  %v821_v25 = vxor.u32 2147483648, %v2891_v51  ;;  %v1000_v36 = vsel %vm2548_vm14, 0, %v2547_v34  ;;  %v1074_v53 = vsel %vm1068_vm13, %v1061_v14, 920167782  ;;  %v1071_v0 = vsel %vm1067_vm12, %v1055_v41, %v1070_v7 }
 0x19d   :  { %v818_v56 = vxor.u32 2147483648, %v2893_v54  ;;  %v1001_v11 = vsub.s32 32, %v1000_v36  ;;  %v1002_v58 = vshll.u32 %v3470_v6, %v1000_v36  ;;  %v1005_v60 = vsub.s32 4294967266, %v1000_v36 }
 0x19e   :  { %v822_v61 = vsel %vm820_vm2, %v821_v25, %v2893_v54  ;;  %v1765_v46 = vsel %vm1763_vm3, %v821_v25, %v2893_v54  ;;  %v1075_v13 = vsel %vm1067_vm12, %v1058_v23, %v1074_v53  ;;  %v1078_v62 = vsel %vm1068_vm13, %v1064_v33, 1326507024 }
 0x19f   :  { %v819_v37 = vsel %vm817_vm4, %v2891_v51, %v818_v56  ;;  %v1762_v59 = vsel %vm1760_vm5, %v2891_v51, %v818_v56  ;;  %v1003_v6 = vshrl.u32 %v985_v30, %v1001_v11  ;;  %v1006_v16 = vadd.s32 127, %v1005_v60 }
 0x1a0   :  { %v823_v27 = vsel %vm816_vm6, %v819_v37, %v822_v61  ;;  %v1766_v17 = vsel %vm1759_vm7, %v1762_v59, %v1765_v46  ;;  %v1076_v19 = vsel %vm1066_vm11, %v1073_v31, %v1075_v13  ;;  %v1140_v35 = vand.u32 2139095040, %v3244_v5 }
 0x1a1   :  { %v824_v55 = vsel %vm813_vm8, nan, %v823_v27  ;;  %v1767_v1 = vsel %vm813_vm8, nan, %v1766_v17  ;;  %v1004_v30 = vor.u32 %v1003_v6, %v1002_v58  ;;  %v1007_v8 = vshll.u32 %v1006_v16, 23 }
 0x1a2   :  { %1554 = vst [vmem:[#allocation7 + $0x8] sm:$0xff] %v824_v55  ;;  %2490 = vst [vmem:[#allocation8 + $0x8] sm:$0xff] %v1767_v1  ;;  %v3554_v2 = vmul.u32.u64.low %v3482_v9, %v1076_v19  ;;  %v3555_v43 = vmul.u32.u64.high %v3482_v9, %v1076_v19, %v3554_v2  ;;  %v1079_v15 = vsel %vm1067_vm12, %v1061_v14, %v1078_v62  ;;  %vm1252_vm15 = vcmp.gt.s32.totalorder %v3496_v39, 0 }
 0x1a3   :  { %v1008_v28 = vor.u32 4788187, %v1007_v8  ;;  %v1011_v41 = vcvt.s32.f32 %v1004_v30  ;;  %v1018_v23 = vsel %vm3508_vm9, 0, %v1016_v24  ;;  %v1072_v40 = vsel %vm1066_vm11, %v1069_v4, %v1071_v0 }
 0x1a4   :  { %v1080_v57 = vsel %vm1066_vm11, %v1077_v21, %v1079_v15  ;;  %v1253_v34 = vsel %vm1252_vm15, %v3496_v39, 0  ;;  %v1091_v14 = vadd.s32 1, %v3555_v43  ;;  %v3578_v24 = vshll.u32 %v1249_v12, 8 }
 0x1a5   :  { %v1009_v45 = vand.u32 2147483647, %v1008_v28  ;;  %v3570_v49 = vmul.u32.u64.low %v3482_v9, %v1080_v57  ;;  %v3571_v51 = vmul.u32.u64.high %v3482_v9, %v1080_v57, %v3570_v49  ;;  %v3573_v33 = vshrl.u32 %v1253_v34, 5 }
 0x1a6   :  { %v1255_v7 = vand.u32 31, %v1253_v34  ;;  %v1022_v54 = vadd.s32 3, %v1018_v23  ;;  %v1088_v20 = vmul.u32 %v3482_v9, %v1072_v40  ;;  %v1141_v25 = vshrl.u32 %v1140_v35, 23 }
 0x1a7   :  { %v1012_v4 = vmul.f32 %v1011_v41, %v1009_v45  ;;  %vm1273_vm0 = vcmp.lt.s32.totalorder %v3573_v33, 1  ;;  %vm1090_vm2 = vc.u32 %v3571_v51, %v3554_v2  ;;  %vm1275_vm3 = vcmp.lt.s32.totalorder %v3573_v33, 3 }
 0x1a8   :  { %v1256_v39 = vsub.s32 32, %v1255_v7  ;;  %v1258_v36 = vshll.u32 %v3019_v42, %v1255_v7  ;;  %v1261_v31 = vshll.u32 %v3020_v44, %v1255_v7  ;;  %v1264_v10 = vshll.u32 %v3021_v48, %v1255_v7 }
 0x1a9   :  { %v1013_v53 = vxor.u32 2147483648, %v1012_v4  ;;  %v1267_v12 = vshll.u32 %v3022_v50, %v1255_v7  ;;  %v1092_v56 = vsel %vm1090_vm2, %v1091_v14, %v3555_v43  ;;  %v1270_v59 = vshll.u32 %v3023_v52, %v1255_v7 }
 0x1aa   :  { %v1259_v9 = vshrl.u32 %v3020_v44, %v1256_v39  ;;  %v1262_v11 = vshrl.u32 %v3021_v48, %v1256_v39  ;;  %v1093_v60 = vadd.s32 %v1092_v56, %v1088_v20  ;;  %v1265_v61 = vshrl.u32 %v3022_v50, %v1256_v39 }
 0x1ab   :  { %v1014_v58 = vsel %vm931_vm1, %v1013_v53, %v1012_v4  ;;  %v1268_v46 = vshrl.u32 %v3023_v52, %v1256_v39  ;;  %v1271_v17 = vshrl.u32 %v3024_v47, %v1256_v39  ;;  %vm1274_vm1 = vcmp.lt.s32.totalorder %v3573_v33, 2 }
 0x1ac   :  { %v1017_v0 = vsel %vm3508_vm9, %v3107_v18, %v1014_v58  ;;  %v1260_v13 = vor.u32 %v1259_v9, %v1258_v36  ;;  %v1263_v37 = vor.u32 %v1262_v11, %v1261_v31  ;;  %v1094_v6 = vadd.s32 536870912, %v1093_v60 }
 0x1ad   :  { %2894 = vcosq.f32 %v1017_v0  ;;  %v1266_v16 = vor.u32 %v1265_v61, %v1264_v10  ;;  %v1269_v27 = vor.u32 %v1268_v46, %v1267_v12  ;;  %vm1276_vm4 = vcmp.lt.s32.totalorder %v3573_v33, 4 }
 0x1ae   :  { %2896 = vsinq.f32 %v1017_v0  ;;  %v1095_v19 = vshrl.u32 %v1094_v6, 30  ;;  %v1257_v21 = vshrl.u32 %v3019_v42, %v1256_v39  ;;  %v1281_v32 = vsel %vm1273_vm0, %v1260_v13, %v1263_v37 }
 0x1af   :  { %v1282_v55 = vsel %vm1276_vm4, %v1269_v27, 920167782  ;;  %v1272_v1 = vor.u32 %v1271_v17, %v1270_v59  ;;  %v1278_v30 = vsel %vm1276_vm4, %v1266_v16, 2102212464  ;;  %v2553_v62 = vadd.s32 4294967169, %v1141_v25 }
 0x1b0   :  { %v1283_v8 = vsel %vm1275_vm3, %v1266_v16, %v1282_v55  ;;  %v1096_v43 = vshll.u32 %v1095_v19, 30  ;;  %v1285_v28 = vsel %vm1273_vm0, %v1263_v37, %v1266_v16  ;;  %v1964_v41 = vand.u32 3, %v1018_v23 }
 0x1b1   :  { %v1284_v35 = vsel %vm1274_vm1, %v1281_v32, %v1283_v8  ;;  %v1286_v15 = vsel %vm1276_vm4, %v1272_v1, 1326507024  ;;  %v1277_v45 = vsel %vm1273_vm0, %v1257_v21, %v1260_v13  ;;  %v1279_v49 = vsel %vm1275_vm3, %v1263_v37, %v1278_v30 }
 0x1b2   :  { %v3613_v40 = vmul.u32.u64.low %v3578_v24, %v1284_v35  ;;  %v3614_v57 = vmul.u32.u64.high %v3578_v24, %v1284_v35, %v3613_v40  ;;  %v3617_v34 = vsub.s32 %v1093_v60, %v1096_v43  ;;  %v1287_v14 = vsel %vm1275_vm3, %v1269_v27, %v1286_v15 }
 0x1b3   :  { %v1023_v7 = vand.u32 3, %v1022_v54  ;;  %v1288_v23 = vsel %vm1274_vm1, %v1285_v28, %v1287_v14  ;;  %v1147_v4 = vadd.s32 1, %v2553_v62  ;;  %vm1021_vm5 = vweird.f32 %v3107_v18 }
 0x1b4   :  { %vm1035_vm6 = vcmp.lt.s32.totalorder %v3237_v63, 0  ;;  %v1099_v20 = vsub.s32 0, %v3617_v34  ;;  %v1137_v25 = vand.u32 2147483647, %v3244_v5  ;;  %vm1965_vm7 = vcmp.lt.s32.totalorder %v1964_v41, 2 }
 0x1b5   :  { %v1280_v39 = vsel %vm1274_vm1, %v1277_v45, %v1279_v49  ;;  %v3634_v36 = vmul.u32.u64.low %v3578_v24, %v1288_v23  ;;  %v3635_v31 = vmul.u32.u64.high %v3578_v24, %v1288_v23, %v3634_v36  ;;  %vm1966_vm8 = vcmp.eq.s32.totalorder %v1964_v41, 0 }
 0x1b6   :  { %vm1969_vm9 = vcmp.eq.s32.totalorder %v1964_v41, 2  ;;  %v2550_v53 = vmin.u32 %v1099_v20, %v3617_v34  ;;  %vm1148_vm10 = vcmp.gt.s32.totalorder %v1147_v4, 0  ;;  %vm1024_vm11 = vcmp.lt.s32.totalorder %v1023_v7, 2 }
 0x1b7   :  { %v2895_v54 = vpop.eup %2894  ;;  %v1119_v56 = vsub.s32 4, %v1095_v19  ;;  %v1299_v9 = vadd.s32 1, %v3614_v57  ;;  %vm1028_vm12 = vcmp.eq.s32.totalorder %v1023_v7, 2  ;;  %v1296_v58 = vmul.u32 %v3578_v24, %v1280_v39 }
 0x1b8   :  { %v2897_v10 = vpop.eup %2896  ;;  %v1029_v12 = vxor.u32 2147483648, %v2895_v54  ;;  %v1101_v33 = vclz %v2550_v53  ;;  %vm1025_vm13 = vcmp.eq.s32.totalorder %v1023_v7, 0  ;;  %v1149_v46 = vsel %vm1148_vm10, %v1147_v4, 0 }
 0x1b9   :  { %v1026_v11 = vxor.u32 2147483648, %v2897_v10  ;;  %vm1298_vm14 = vc.u32 %v3635_v31, %v3613_v40  ;;  %v1120_v16 = vsel %vm1035_vm6, %v1119_v56, %v1095_v19  ;;  %vm3654_vm0 = vcmp.le.f32.partialorder %v1033_v29, 0.7853982 }
 0x1ba   :  { %v1030_v60 = vsel %vm1028_vm12, %v1029_v12, %v2897_v10  ;;  %v1971_v61 = vsel %vm1969_vm9, %v1029_v12, %v2897_v10  ;;  %v2551_v37 = vadd.s32 4294967294, %v1101_v33  ;;  %v1300_v24 = vsel %vm1298_vm14, %v1299_v9, %v3614_v57 }
 0x1bb   :  { %v1027_v0 = vsel %vm1025_vm13, %v2895_v54, %v1026_v11  ;;  %v1968_v13 = vsel %vm1966_vm8, %v2895_v54, %v1026_v11  ;;  %v1301_v21 = vadd.s32 %v1300_v24, %v1296_v58  ;;  %v1144_v19 = vand.u32 8388607, %v1137_v25 }
 0x1bc   :  { %v1031_v59 = vsel %vm1024_vm11, %v1027_v0, %v1030_v60  ;;  %v1972_v6 = vsel %vm1965_vm7, %v1968_v13, %v1971_v61  ;;  %vm2552_vm15 = vcmp.lt.s32.totalorder %v2551_v37, 0  ;;  %v1151_v1 = vand.u32 31, %v1149_v46 }
 0x1bd   :  { %v1032_v27 = vsel %vm1021_vm5, nan, %v1031_v59  ;;  %v1973_v17 = vsel %vm1021_vm5, nan, %v1972_v6  ;;  %v1104_v55 = vsel %vm2552_vm15, 0, %v2551_v37  ;;  %v1089_v30 = vadd.s32 %v3554_v2, %v3571_v51 }
 0x1be   :  { %1556 = vst [vmem:[#allocation7 + $0x18] sm:$0xff] %v1032_v27  ;;  %2492 = vst [vmem:[#allocation8 + $0x18] sm:$0xff] %v1973_v17  ;;  %v1105_v18 = vsub.s32 32, %v1104_v55  ;;  %v1109_v8 = vsub.s32 4294967266, %v1104_v55  ;;  %v1302_v62 = vadd.s32 536870912, %v1301_v21  ;;  %v1122_v43 = vsel %vm3654_vm0, 0, %v1120_v16 }
 0x1bf   :  { %v1152_v35 = vsub.s32 32, %v1151_v1  ;;  %v1106_v29 = vshll.u32 %v3617_v34, %v1104_v55  ;;  %v1145_v57 = vor.u32 8388608, %v1144_v19  ;;  %v1126_v51 = vadd.s32 3, %v1122_v43 }
 0x1c0   :  { %v1107_v28 = vshrl.u32 %v1089_v30, %v1105_v18  ;;  %v1110_v41 = vadd.s32 127, %v1109_v8  ;;  %v3665_v15 = vshrl.u32 %v1302_v62, 30  ;;  %v1150_v39 = vshrl.u32 %v1149_v46, 5 }
 0x1c1   :  { %v1155_v2 = vshrl.u32 %v3020_v44, %v1152_v35  ;;  %v1158_v7 = vshrl.u32 %v3021_v48, %v1152_v35  ;;  %v1161_v23 = vshrl.u32 %v3022_v50, %v1152_v35  ;;  %v1164_v4 = vshrl.u32 %v3023_v52, %v1152_v35 }
 0x1c2   :  { %v1108_v45 = vor.u32 %v1107_v28, %v1106_v29  ;;  %v1111_v49 = vshll.u32 %v1110_v41, 23  ;;  %v1304_v14 = vshll.u32 %v3665_v15, 30  ;;  %v1154_v36 = vshll.u32 %v3019_v42, %v1151_v1 }
 0x1c3   :  { %v1157_v54 = vshll.u32 %v3020_v44, %v1151_v1  ;;  %v1160_v53 = vshll.u32 %v3021_v48, %v1151_v1  ;;  %v1163_v10 = vshll.u32 %v3022_v50, %v1151_v1  ;;  %v1167_v12 = vshrl.u32 %v3024_v47, %v1152_v35 }
 0x1c4   :  { %v1112_v20 = vor.u32 4788187, %v1111_v49  ;;  %v3672_v34 = vsub.s32 %v1301_v21, %v1304_v14  ;;  %v1115_v9 = vcvt.s32.f32 %v1108_v45  ;;  %v1156_v33 = vor.u32 %v1155_v2, %v1154_v36 }
 0x1c5   :  { %v1159_v58 = vor.u32 %v1158_v7, %v1157_v54  ;;  %v1162_v60 = vor.u32 %v1161_v23, %v1160_v53  ;;  %v1165_v61 = vor.u32 %v1164_v4, %v1163_v10  ;;  %v1166_v46 = vshll.u32 %v3023_v52, %v1151_v1 }
 0x1c6   :  { %v1113_v56 = vand.u32 2147483647, %v1112_v20  ;;  %v1307_v11 = vsub.s32 0, %v3672_v34  ;;  %v3681_v13 = vand.u32 3, %v1122_v43  ;;  %v3684_v59 = vshll.u32 %v1145_v57, 8 }
 0x1c7   :  { %vm1243_vm2 = vcmp.lt.s32.totalorder %v3242_v3, 0  ;;  %v1297_v6 = vadd.s32 %v3613_v40, %v3635_v31  ;;  %v1168_v16 = vor.u32 %v1167_v12, %v1166_v46  ;;  %vm1169_vm3 = vcmp.lt.s32.totalorder %v1150_v39, 1 }
 0x1c8   :  { %v1116_v0 = vmul.f32 %v1115_v9, %v1113_v56  ;;  %v2558_v37 = vmin.u32 %v1307_v11, %v3672_v34  ;;  %vm1170_vm1 = vcmp.lt.s32.totalorder %v1150_v39, 2  ;;  %v1153_v17 = vshrl.u32 %v3019_v42, %v1152_v35 }
 0x1c9   :  { %vm1172_vm4 = vcmp.lt.s32.totalorder %v1150_v39, 4  ;;  %vm1171_vm5 = vcmp.lt.s32.totalorder %v1150_v39, 3  ;;  %v1177_v55 = vsel %vm1169_vm3, %v1156_v33, %v1159_v58  ;;  %v1181_v40 = vsel %vm1169_vm3, %v1159_v58, %v1162_v60 }
 0x1ca   :  { %v1117_v24 = vxor.u32 2147483648, %v1116_v0  ;;  %v1309_v27 = vclz %v2558_v37  ;;  %v1174_v21 = vsel %vm1172_vm4, %v1162_v60, 2102212464  ;;  %v1178_v19 = vsel %vm1172_vm4, %v1165_v61, 920167782 }
 0x1cb   :  { %v1179_v18 = vsel %vm1171_vm5, %v1162_v60, %v1178_v19  ;;  %v1327_v8 = vsub.s32 4, %v3665_v15  ;;  %v1173_v62 = vsel %vm1169_vm3, %v1153_v17, %v1156_v33  ;;  %v1182_v43 = vsel %vm1172_vm4, %v1168_v16, 1326507024 }
 0x1cc   :  { %v1118_v1 = vsel %vm1035_vm6, %v1117_v24, %v1116_v0  ;;  %v2559_v30 = vadd.s32 4294967294, %v1309_v27  ;;  %v1180_v35 = vsel %vm1170_vm1, %v1177_v55, %v1179_v18  ;;  %v1183_v29 = vsel %vm1171_vm5, %v1165_v61, %v1182_v43 }
 0x1cd   :  { %v1121_v31 = vsel %vm3654_vm0, %v3237_v63, %v1118_v1  ;;  %v1175_v41 = vsel %vm1171_vm5, %v1159_v58, %v1174_v21  ;;  %v1184_v57 = vsel %vm1170_vm1, %v1181_v40, %v1183_v29  ;;  %v1348_v14 = vand.u32 2139095040, %v3250_v38 }
 0x1ce   :  { %2898 = vcosq.f32 %v1121_v31  ;;  %vm2560_vm7 = vcmp.lt.s32.totalorder %v2559_v30, 0  ;;  %v3707_v2 = vmul.u32.u64.low %v3684_v59, %v1184_v57  ;;  %v3708_v7 = vmul.u32.u64.high %v3684_v59, %v1184_v57, %v3707_v2 }
 0x1cf   :  { %2900 = vsinq.f32 %v1121_v31  ;;  %v1312_v28 = vsel %vm2560_vm7, 0, %v2559_v30  ;;  %v3711_v23 = vmul.u32.u64.low %v3684_v59, %v1180_v35  ;;  %v3712_v4 = vmul.u32.u64.high %v3684_v59, %v1180_v35, %v3711_v23 }
 0x1d0   :  { %v1313_v45 = vsub.s32 32, %v1312_v28  ;;  %v1314_v32 = vshll.u32 %v3672_v34, %v1312_v28  ;;  %v1317_v49 = vsub.s32 4294967266, %v1312_v28  ;;  %v1349_v54 = vshrl.u32 %v1348_v14, 23 }
 0x1d1   :  { %v1127_v53 = vand.u32 3, %v1126_v51  ;;  %vm3717_vm6 = vcmp.le.f32.partialorder %v1241_v22, 0.7853982  ;;  %v1176_v10 = vsel %vm1170_vm1, %v1173_v62, %v1175_v41  ;;  %v1328_v9 = vsel %vm1243_vm2, %v1327_v8, %v3665_v15 }
 0x1d2   :  { %v1315_v20 = vshrl.u32 %v1297_v6, %v1313_v45  ;;  %v1318_v36 = vadd.s32 127, %v1317_v49  ;;  %v2561_v11 = vadd.s32 4294967169, %v1349_v54  ;;  %vm1125_vm8 = vweird.f32 %v3237_v63 }
 0x1d3   :  { %vm2068_vm9 = vcmp.lt.s32.totalorder %v3681_v13, 2  ;;  %vm2069_vm10 = vcmp.eq.s32.totalorder %v3681_v13, 0  ;;  %vm1194_vm11 = vc.u32 %v3708_v7, %v3711_v23  ;;  %v1195_v22 = vadd.s32 1, %v3712_v4 }
 0x1d4   :  { %v1316_v12 = vor.u32 %v1315_v20, %v1314_v32  ;;  %v1319_v56 = vshll.u32 %v1318_v36, 23  ;;  %v1192_v33 = vmul.u32 %v3684_v59, %v1176_v10  ;;  %v1355_v58 = vadd.s32 1, %v2561_v11 }
 0x1d5   :  { %vm2072_vm12 = vcmp.eq.s32.totalorder %v3681_v13, 2  ;;  %v1330_v15 = vsel %vm3717_vm6, 0, %v1328_v9  ;;  %v1196_v60 = vsel %vm1194_vm11, %v1195_v22, %v3712_v4  ;;  %v1345_v61 = vand.u32 2147483647, %v3250_v38 }
 0x1d6   :  { %v1320_v51 = vor.u32 4788187, %v1319_v56  ;;  %v1323_v39 = vcvt.s32.f32 %v1316_v12  ;;  %vm1128_vm13 = vcmp.lt.s32.totalorder %v1127_v53, 2  ;;  %v1197_v37 = vadd.s32 %v1196_v60, %v1192_v33 }
 0x1d7   :  { %vm1356_vm14 = vcmp.gt.s32.totalorder %v1355_v58, 0  ;;  %vm1129_vm15 = vcmp.eq.s32.totalorder %v1127_v53, 0  ;;  %vm1132_vm0 = vcmp.eq.s32.totalorder %v1127_v53, 2  ;;  %v1334_v17 = vadd.s32 3, %v1330_v15 }
 0x1d8   :  { %v2899_v46 = vpop.eup %2898  ;;  %v1321_v0 = vand.u32 2147483647, %v1320_v51  ;;  %v1357_v59 = vsel %vm1356_vm14, %v1355_v58, 0  ;;  %v1198_v21 = vadd.s32 536870912, %v1197_v37  ;;  %v1452_v30 = vand.u32 2139095040, %v3459_v26 }
 0x1d9   :  { %v2901_v6 = vpop.eup %2900  ;;  %v1133_v16 = vxor.u32 2147483648, %v2899_v46  ;;  %v1359_v1 = vand.u32 31, %v1357_v59  ;;  %v3747_v35 = vand.u32 3, %v1330_v15  ;;  %v3759_v32 = vand.u32 3, %v1334_v17 }
 0x1da   :  { %v1130_v24 = vxor.u32 2147483648, %v2901_v6  ;;  %v1324_v27 = vmul.f32 %v1323_v39, %v1321_v0  ;;  %v3742_v8 = vshrl.u32 %v1198_v21, 30  ;;  %v1352_v49 = vand.u32 8388607, %v1345_v61 }
 0x1db   :  { %v1134_v55 = vsel %vm1132_vm0, %v1133_v16, %v2901_v6  ;;  %v2074_v19 = vsel %vm2072_vm12, %v1133_v16, %v2901_v6  ;;  %v1360_v29 = vsub.s32 32, %v1359_v1  ;;  %v1453_v14 = vshrl.u32 %v1452_v30, 23 }
 0x1dc   :  { %v1131_v18 = vsel %vm1129_vm15, %v2899_v46, %v1130_v24  ;;  %v2071_v40 = vsel %vm2069_vm10, %v2899_v46, %v1130_v24  ;;  %v1325_v31 = vxor.u32 2147483648, %v1324_v27  ;;  %v1200_v45 = vshll.u32 %v3742_v8, 30 }
 0x1dd   :  { %v1135_v62 = vsel %vm1128_vm13, %v1131_v18, %v1134_v55  ;;  %v2075_v43 = vsel %vm2068_vm9, %v2071_v40, %v2074_v19  ;;  %v1362_v2 = vshll.u32 %v3019_v42, %v1359_v1  ;;  %v1363_v4 = vshrl.u32 %v3020_v44, %v1360_v29 }
 0x1de   :  { %v1136_v28 = vsel %vm1125_vm8, nan, %v1135_v62  ;;  %v2076_v41 = vsel %vm1125_vm8, nan, %v2075_v43  ;;  %v1326_v57 = vsel %vm1243_vm2, %v1325_v31, %v1324_v27  ;;  %v3763_v63 = vsub.s32 %v1197_v37, %v1200_v45 }
 0x1df   :  { %1557 = vst [vmem:[#allocation7 + $0x20] sm:$0xff] %v1136_v28  ;;  %2493 = vst [vmem:[#allocation8 + $0x20] sm:$0xff] %v2076_v41  ;;  %v1329_v13 = vsel %vm3717_vm6, %v3242_v3, %v1326_v57  ;;  %v1365_v20 = vshll.u32 %v3020_v44, %v1359_v1  ;;  %v1366_v36 = vshrl.u32 %v3021_v48, %v1360_v29  ;;  %v3771_v34 = vshrl.u32 %v1357_v59, 5 }
 0x1e0   :  { %2902 = vcosq.f32 %v1329_v13  ;;  %v1368_v54 = vshll.u32 %v3021_v48, %v1359_v1  ;;  %v1203_v53 = vsub.s32 0, %v3763_v63  ;;  %v1369_v10 = vshrl.u32 %v3022_v50, %v1360_v29 }
 0x1e1   :  { %2904 = vsinq.f32 %v1329_v13  ;;  %v1449_v12 = vand.u32 2147483647, %v3459_v26  ;;  %v1353_v56 = vor.u32 8388608, %v1352_v49  ;;  %v1371_v9 = vshll.u32 %v3022_v50, %v1359_v1 }
 0x1e2   :  { %v1372_v11 = vshrl.u32 %v3023_v52, %v1360_v29  ;;  %v2565_v22 = vadd.s32 4294967169, %v1453_v14  ;;  %vm1340_vm2 = vcmp.eq.s32.totalorder %v3759_v32, 2  ;;  %vm2278_vm3 = vcmp.eq.s32.totalorder %v3747_v35, 2 }
 0x1e3   :  { %v2554_v51 = vmin.u32 %v1203_v53, %v3763_v63  ;;  %v1361_v39 = vshrl.u32 %v3019_v42, %v1360_v29  ;;  %v1374_v33 = vshll.u32 %v3023_v52, %v1359_v1  ;;  %v1375_v58 = vshrl.u32 %v3024_v47, %v1360_v29 }
 0x1e4   :  { %vm1337_vm1 = vcmp.eq.s32.totalorder %v3759_v32, 0  ;;  %vm2275_vm4 = vcmp.eq.s32.totalorder %v3747_v35, 0  ;;  %v1193_v15 = vadd.s32 %v3711_v23, %v3708_v7  ;;  %v1364_v60 = vor.u32 %v1363_v4, %v1362_v2 }
 0x1e5   :  { %v1367_v46 = vor.u32 %v1366_v36, %v1365_v20  ;;  %v1370_v0 = vor.u32 %v1369_v10, %v1368_v54  ;;  %vm1336_vm5 = vcmp.lt.s32.totalorder %v3759_v32, 2  ;;  %vm2274_vm7 = vcmp.lt.s32.totalorder %v3747_v35, 2 }
 0x1e6   :  { %v1205_v37 = vclz %v2554_v51  ;;  %v1373_v6 = vor.u32 %v1372_v11, %v1371_v9  ;;  %v1376_v16 = vor.u32 %v1375_v58, %v1374_v33  ;;  %vm1377_vm6 = vcmp.lt.s32.totalorder %v3771_v34, 1 }
 0x1e7   :  { %vm1333_vm8 = vweird.f32 %v3242_v3  ;;  %v1223_v59 = vsub.s32 4, %v3742_v8  ;;  %v3792_v24 = vshll.u32 %v1353_v56, 8  ;;  %v3796_v7 = vand.u32 8388607, %v1449_v12 }
 0x1e8   :  { %v1459_v23 = vadd.s32 1, %v2565_v22  ;;  %v2555_v27 = vadd.s32 4294967294, %v1205_v37  ;;  %vm1379_vm9 = vcmp.lt.s32.totalorder %v3771_v34, 3  ;;  %vm1380_vm10 = vcmp.lt.s32.totalorder %v3771_v34, 4 }
 0x1e9   :  { %v1381_v17 = vsel %vm1377_vm6, %v1361_v39, %v1364_v60  ;;  %vm1139_vm11 = vcmp.lt.s32.totalorder %v3244_v5, 0  ;;  %vm1378_vm12 = vcmp.lt.s32.totalorder %v3771_v34, 2  ;;  %v1382_v21 = vsel %vm1380_vm10, %v1370_v0, 2102212464 }
 0x1ea   :  { %v1385_v55 = vsel %vm1377_vm6, %v1364_v60, %v1367_v46  ;;  %v1386_v19 = vsel %vm1380_vm10, %v1373_v6, 920167782  ;;  %v2903_v1 = vpop.eup %2902  ;;  %vm2556_vm13 = vcmp.lt.s32.totalorder %v2555_v27, 0  ;;  %v1383_v30 = vsel %vm1379_vm9, %v1367_v46, %v1382_v21 }
 0x1eb   :  { %v1387_v18 = vsel %vm1379_vm9, %v1370_v0, %v1386_v19  ;;  %v1390_v40 = vsel %vm1380_vm10, %v1376_v16, 1326507024  ;;  %v2905_v31 = vpop.eup %2904  ;;  %v1341_v62 = vxor.u32 2147483648, %v2903_v1  ;;  %v1208_v43 = vsel %vm2556_vm13, 0, %v2555_v27 }
 0x1ec   :  { %v1384_v29 = vsel %vm1378_vm12, %v1381_v17, %v1383_v30  ;;  %v1389_v28 = vsel %vm1377_vm6, %v1367_v46, %v1370_v0  ;;  %v1338_v41 = vxor.u32 2147483648, %v2905_v31  ;;  %v1209_v57 = vsub.s32 32, %v1208_v43 }
 0x1ed   :  { %v1213_v45 = vsub.s32 4294967266, %v1208_v43  ;;  %v1388_v13 = vsel %vm1378_vm12, %v1385_v55, %v1387_v18  ;;  %v1342_v49 = vsel %vm1340_vm2, %v1341_v62, %v2905_v31  ;;  %v2280_v14 = vsel %vm2278_vm3, %v1341_v62, %v2905_v31 }
 0x1ee   :  { %v1210_v2 = vshll.u32 %v3763_v63, %v1208_v43  ;;  %v1391_v4 = vsel %vm1379_vm9, %v1373_v6, %v1390_v40  ;;  %v1339_v20 = vsel %vm1337_vm1, %v2903_v1, %v1338_v41  ;;  %v2277_v36 = vsel %vm2275_vm4, %v2903_v1, %v1338_v41 }
 0x1ef   :  { %v1211_v54 = vshrl.u32 %v1193_v15, %v1209_v57  ;;  %v1214_v53 = vadd.s32 127, %v1213_v45  ;;  %v1343_v10 = vsel %vm1336_vm5, %v1339_v20, %v1342_v49  ;;  %v2281_v56 = vsel %vm2274_vm7, %v2277_v36, %v2280_v14 }
 0x1f0   :  { %v1392_v63 = vsel %vm1378_vm12, %v1389_v28, %v1391_v4  ;;  %vm1460_vm14 = vcmp.gt.s32.totalorder %v1459_v23, 0  ;;  %v1344_v9 = vsel %vm1333_vm8, nan, %v1343_v10  ;;  %v2282_v11 = vsel %vm1333_vm8, nan, %v2281_v56 }
 0x1f1   :  { %v1212_v22 = vor.u32 %v1211_v54, %v1210_v2  ;;  %v1215_v51 = vshll.u32 %v1214_v53, 23  ;;  %1559 = vst [vmem:[#allocation7 + $0x30] sm:$0xff] %v1344_v9  ;;  %2495 = vst [vmem:[#allocation8 + $0x30] sm:$0xff] %v2282_v11  ;;  %v3838_v32 = vmul.u32.u64.low %v3792_v24, %v1392_v63  ;;  %v3839_v39 = vmul.u32.u64.high %v3792_v24, %v1392_v63, %v3838_v32 }
 0x1f2   :  { %v3842_v35 = vmul.u32.u64.low %v3792_v24, %v1388_v13  ;;  %v3843_v33 = vmul.u32.u64.high %v3792_v24, %v1388_v13, %v3842_v35  ;;  %v1224_v58 = vsel %vm1139_vm11, %v1223_v59, %v3742_v8  ;;  %v1461_v3 = vsel %vm1460_vm14, %v1459_v23, 0 }
 0x1f3   :  { %v1216_v34 = vor.u32 4788187, %v1215_v51  ;;  %vm3851_vm15 = vcmp.le.f32.partialorder %v1137_v25, 0.7853982  ;;  %v1463_v60 = vand.u32 31, %v1461_v3  ;;  %v1219_v0 = vcvt.s32.f32 %v1212_v22 }
 0x1f4   :  { %v1400_v37 = vmul.u32 %v3792_v24, %v1384_v29  ;;  %v1457_v6 = vor.u32 8388608, %v3796_v7  ;;  %v1226_v16 = vsel %vm3851_vm15, 0, %v1224_v58  ;;  %vm1402_vm0 = vc.u32 %v3839_v39, %v3842_v35 }
 0x1f5   :  { %v1217_v46 = vand.u32 2147483647, %v1216_v34  ;;  %v1403_v8 = vadd.s32 1, %v3843_v33  ;;  %v1464_v59 = vsub.s32 32, %v1463_v60  ;;  %v1462_v23 = vshrl.u32 %v1461_v3, 5 }
 0x1f6   :  { %v1466_v27 = vshll.u32 %v3019_v42, %v1463_v60  ;;  %v1469_v17 = vshll.u32 %v3020_v44, %v1463_v60  ;;  %v1472_v55 = vshll.u32 %v3021_v48, %v1463_v60  ;;  %v1475_v18 = vshll.u32 %v3022_v50, %v1463_v60 }
 0x1f7   :  { %v1220_v25 = vmul.f32 %v1219_v0, %v1217_v46  ;;  %v1404_v21 = vsel %vm1402_vm0, %v1403_v8, %v3843_v33  ;;  %v1467_v24 = vshrl.u32 %v3020_v44, %v1464_v59  ;;  %v1470_v7 = vshrl.u32 %v3021_v48, %v1464_v59 }
 0x1f8   :  { %v1405_v1 = vadd.s32 %v1404_v21, %v1400_v37  ;;  %v1473_v30 = vshrl.u32 %v3022_v50, %v1464_v59  ;;  %v1476_v62 = vshrl.u32 %v3023_v52, %v1464_v59  ;;  %v1478_v43 = vshll.u32 %v3023_v52, %v1463_v60 }
 0x1f9   :  { %v1221_v19 = vxor.u32 2147483648, %v1220_v25  ;;  %v1468_v40 = vor.u32 %v1467_v24, %v1466_v27  ;;  %v1471_v31 = vor.u32 %v1470_v7, %v1469_v17  ;;  %v1479_v41 = vshrl.u32 %v3024_v47, %v1464_v59 }
 0x1fa   :  { %v1406_v44 = vadd.s32 536870912, %v1405_v1  ;;  %v1474_v28 = vor.u32 %v1473_v30, %v1472_v55  ;;  %v1230_v57 = vadd.s32 3, %v1226_v16  ;;  %v1477_v45 = vor.u32 %v1476_v62, %v1475_v18 }
 0x1fb   :  { %v1222_v29 = vsel %vm1139_vm11, %v1221_v19, %v1220_v25  ;;  %v1497_v50 = vshll.u32 %v1457_v6, 8  ;;  %v1480_v49 = vor.u32 %v1479_v41, %v1478_v43  ;;  %vm1481_vm2 = vcmp.lt.s32.totalorder %v1462_v23, 1 }
 0x1fc   :  { %v1225_v48 = vsel %vm3851_vm15, %v3244_v5, %v1222_v29  ;;  %v3878_v13 = vshrl.u32 %v1406_v44, 30  ;;  %v1465_v52 = vshrl.u32 %v3019_v42, %v1464_v59  ;;  %vm1484_vm3 = vcmp.lt.s32.totalorder %v1462_v23, 4 }
 0x1fd   :  { %2906 = vcosq.f32 %v1225_v48  ;;  %v1489_v14 = vsel %vm1481_vm2, %v1468_v40, %v1471_v31  ;;  %vm1483_vm1 = vcmp.lt.s32.totalorder %v1462_v23, 3  ;;  %v1486_v47 = vsel %vm1484_vm3, %v1474_v28, 2102212464 }
 0x1fe   :  { %2908 = vsinq.f32 %v1225_v48  ;;  %v1408_v2 = vshll.u32 %v3878_v13, 30  ;;  %v1490_v4 = vsel %vm1484_vm3, %v1477_v45, 920167782  ;;  %vm1482_vm4 = vcmp.lt.s32.totalorder %v1462_v23, 2 }
 0x1ff   :  { %v1491_v20 = vsel %vm1483_vm1, %v1474_v28, %v1490_v4  ;;  %v1493_v36 = vsel %vm1481_vm2, %v1471_v31, %v1474_v28  ;;  %v1494_v54 = vsel %vm1484_vm3, %v1480_v49, 1326507024  ;;  %v1485_v10 = vsel %vm1481_vm2, %v1465_v52, %v1468_v40 }
 0x200   :  { %v1409_v53 = vsub.s32 %v1405_v1, %v1408_v2  ;;  %v1492_v56 = vsel %vm1482_vm4, %v1489_v14, %v1491_v20  ;;  %v1487_v63 = vsel %vm1483_vm1, %v1471_v31, %v1486_v47  ;;  %v1495_v9 = vsel %vm1483_vm1, %v1477_v45, %v1494_v54 }
 0x201   :  { %v3883_v11 = vmul.u32.u64.low %v1497_v50, %v1492_v56  ;;  %v3884_v22 = vmul.u32.u64.high %v1497_v50, %v1492_v56, %v3883_v11  ;;  %v2170_v42 = vand.u32 3, %v1226_v16  ;;  %v1496_v32 = vsel %vm1482_vm4, %v1493_v36, %v1495_v9 }
 0x202   :  { %v1411_v51 = vsub.s32 0, %v1409_v53  ;;  %v1231_v33 = vand.u32 3, %v1230_v57  ;;  %v3888_v34 = vmul.u32.u64.low %v1497_v50, %v1496_v32  ;;  %v3889_v58 = vmul.u32.u64.high %v1497_v50, %v1496_v32, %v3888_v34 }
 0x203   :  { %v1488_v15 = vsel %vm1482_vm4, %v1485_v10, %v1487_v63  ;;  %vm1229_vm5 = vweird.f32 %v3244_v5  ;;  %v1507_v60 = vadd.s32 1, %v3884_v22  ;;  %vm2171_vm7 = vcmp.lt.s32.totalorder %v2170_v42, 2 }
 0x204   :  { %v2562_v3 = vmin.u32 %v1411_v51, %v1409_v53  ;;  %vm2172_vm6 = vcmp.eq.s32.totalorder %v2170_v42, 0  ;;  %vm2175_vm8 = vcmp.eq.s32.totalorder %v2170_v42, 2  ;;  %vm1232_vm9 = vcmp.lt.s32.totalorder %v1231_v33, 2 }
 0x205   :  { %v1504_v16 = vmul.u32 %v1497_v50, %v1488_v15  ;;  %vm1506_vm10 = vc.u32 %v3889_v58, %v3883_v11  ;;  %vm1236_vm11 = vcmp.eq.s32.totalorder %v1231_v33, 2  ;;  %vm1233_vm12 = vcmp.eq.s32.totalorder %v1231_v33, 0 }
 0x206   :  { %v1413_v0 = vclz %v2562_v3  ;;  %v1508_v25 = vsel %vm1506_vm10, %v1507_v60, %v3884_v22  ;;  %v1401_v7 = vadd.s32 %v3842_v35, %v3839_v39  ;;  %v1431_v5 = vsub.s32 4, %v3878_v13 }
 0x207   :  { %v2907_v46 = vpop.eup %2906  ;;  %v1509_v17 = vadd.s32 %v1508_v25, %v1504_v16  ;;  %vm1347_vm14 = vcmp.lt.s32.totalorder %v3250_v38, 0  ;;  %vm1346_vm15 = vcmp.le.f32.partialorder %v1345_v61, 0.7853982  ;;  %v1505_v10 = vadd.s32 %v3883_v11, %v3889_v58 }
 0x208   :  { %v2909_v37 = vpop.eup %2908  ;;  %v1237_v6 = vxor.u32 2147483648, %v2907_v46  ;;  %v2563_v59 = vadd.s32 4294967294, %v1413_v0  ;;  %v1432_v36 = vsel %vm1347_vm14, %v1431_v5, %v3878_v13  ;;  %vm1451_vm2 = vcmp.lt.s32.totalorder %v3459_v26, 0 }
 0x209   :  { %v1234_v8 = vxor.u32 2147483648, %v2909_v37  ;;  %v1510_v30 = vadd.s32 536870912, %v1509_v17  ;;  %v1434_v9 = vsel %vm1346_vm15, 0, %v1432_v36  ;;  %vm3917_vm4 = vcmp.le.f32.partialorder %v1449_v12, 0.7853982 }
 0x20a   :  { %v1238_v23 = vsel %vm1236_vm11, %v1237_v6, %v2909_v37  ;;  %v2177_v27 = vsel %vm2175_vm8, %v1237_v6, %v2909_v37  ;;  %vm2564_vm13 = vcmp.lt.s32.totalorder %v2563_v59, 0  ;;  %v1438_v32 = vadd.s32 3, %v1434_v9 }
 0x20b   :  { %v1235_v21 = vsel %vm1233_vm12, %v2907_v46, %v1234_v8  ;;  %v2174_v24 = vsel %vm2172_vm6, %v2907_v46, %v1234_v8  ;;  %v1416_v1 = vsel %vm2564_vm13, 0, %v2563_v59  ;;  %v1511_v29 = vshrl.u32 %v1510_v30, 30 }
 0x20c   :  { %v1239_v55 = vsel %vm1232_vm9, %v1235_v21, %v1238_v23  ;;  %v2178_v19 = vsel %vm2171_vm7, %v2174_v24, %v2177_v27  ;;  %v1417_v31 = vsub.s32 32, %v1416_v1  ;;  %v1418_v62 = vshll.u32 %v1409_v53, %v1416_v1 }
 0x20d   :  { %v1240_v18 = vsel %vm1229_vm5, nan, %v1239_v55  ;;  %v2179_v40 = vsel %vm1229_vm5, nan, %v2178_v19  ;;  %v1421_v43 = vsub.s32 4294967266, %v1416_v1  ;;  %v1512_v44 = vshll.u32 %v1511_v29, 30 }
 0x20e   :  { %1558 = vst [vmem:[#allocation7 + $0x28] sm:$0xff] %v1240_v18  ;;  %2494 = vst [vmem:[#allocation8 + $0x28] sm:$0xff] %v2179_v40  ;;  %v1419_v39 = vshrl.u32 %v1401_v7, %v1417_v31  ;;  %v2376_v13 = vand.u32 3, %v1434_v9  ;;  %v1439_v3 = vand.u32 3, %v1438_v32  ;;  %v1535_v11 = vsub.s32 4, %v1511_v29 }
 0x20f   :  { %v1422_v35 = vadd.s32 127, %v1421_v43  ;;  %v1513_v48 = vsub.s32 %v1509_v17, %v1512_v44  ;;  %vm1437_vm9 = vweird.f32 %v3250_v38 }
 0x210   :  { %v1420_v28 = vor.u32 %v1419_v39, %v1418_v62  ;;  %vm2377_vm3 = vcmp.lt.s32.totalorder %v2376_v13, 2  ;;  %vm2378_vm1 = vcmp.eq.s32.totalorder %v2376_v13, 0  ;;  %vm1444_vm5 = vcmp.eq.s32.totalorder %v1439_v3, 2 }
 0x211   :  { %v1423_v41 = vshll.u32 %v1422_v35, 23  ;;  %v1515_v50 = vsub.s32 0, %v1513_v48  ;;  %vm2381_vm7 = vcmp.eq.s32.totalorder %v2376_v13, 2  ;;  %vm1440_vm6 = vcmp.lt.s32.totalorder %v1439_v3, 2 }
 0x212   :  { %v1427_v45 = vcvt.s32.f32 %v1420_v28  ;;  %vm1441_vm8 = vcmp.eq.s32.totalorder %v1439_v3, 0  ;;  %v1536_v21 = vsel %vm1451_vm2, %v1535_v11, %v1511_v29 }
 0x213   :  { %v1424_v57 = vor.u32 4788187, %v1423_v41  ;;  %v2566_v52 = vmin.u32 %v1515_v50, %v1513_v48  ;;  %v1538_v1 = vsel %vm3917_vm4, 0, %v1536_v21 }
 0x214   :  { %v1542_v30 = vadd.s32 3, %v1538_v1  ;;  %v2479_v40 = vand.u32 3, %v1538_v1 }
 0x215   :  { %v1425_v49 = vand.u32 2147483647, %v1424_v57  ;;  %v1517_v2 = vclz %v2566_v52 }
 0x216   :  { %v1543_v18 = vand.u32 3, %v1542_v30  ;;  %vm2484_vm11 = vcmp.eq.s32.totalorder %v2479_v40, 2  ;;  %vm2481_vm13 = vcmp.eq.s32.totalorder %v2479_v40, 0 }
 0x217   :  { %v1428_v14 = vmul.f32 %v1427_v45, %v1425_v49  ;;  %v2567_v4 = vadd.s32 4294967294, %v1517_v2 }
 0x218   :  { %vm1548_vm10 = vcmp.eq.s32.totalorder %v1543_v18, 2  ;;  %vm1545_vm12 = vcmp.eq.s32.totalorder %v1543_v18, 0 }
 0x219   :  { %v1429_v47 = vxor.u32 2147483648, %v1428_v14  ;;  %vm2568_vm0 = vcmp.lt.s32.totalorder %v2567_v4, 0 }
 0x21a   :  { %v1520_v53 = vsel %vm2568_vm0, 0, %v2567_v4  ;;  %vm1541_vm0 = vweird.f32 %v3459_v26 }
 0x21b   :  { %v1430_v20 = vsel %vm1347_vm14, %v1429_v47, %v1428_v14  ;;  %v1521_v56 = vsub.s32 32, %v1520_v53  ;;  %v1525_v63 = vsub.s32 4294967266, %v1520_v53  ;;  %v1522_v22 = vshll.u32 %v1513_v48, %v1520_v53 }
 0x21c   :  { %v1433_v54 = vsel %vm1346_vm15, %v3250_v38, %v1430_v20  ;;  %vm1544_vm14 = vcmp.lt.s32.totalorder %v1543_v18, 2  ;;  %vm2480_vm15 = vcmp.lt.s32.totalorder %v2479_v40, 2 }
 0x21d   :  { %2910 = vcosq.f32 %v1433_v54  ;;  %v1523_v42 = vshrl.u32 %v1505_v10, %v1521_v56  ;;  %v1526_v51 = vadd.s32 127, %v1525_v63 }
 0x21e   :  { %2912 = vsinq.f32 %v1433_v54 }
 0x21f   :  { %v1524_v61 = vor.u32 %v1523_v42, %v1522_v22  ;;  %v1527_v33 = vshll.u32 %v1526_v51, 23 }
 0x221   :  { %v1528_v34 = vor.u32 4788187, %v1527_v33  ;;  %v1531_v60 = vcvt.s32.f32 %v1524_v61 }
 0x223   :  { %v1529_v15 = vand.u32 2147483647, %v1528_v34 }
 0x225   :  { %v1532_v0 = vmul.f32 %v1531_v60, %v1529_v15 }
 0x227   :  { %v2911_v46 = vpop.eup %2910  ;;  %v1533_v8 = vxor.u32 2147483648, %v1532_v0 }
 0x228   :  { %v2913_v58 = vpop.eup %2912  ;;  %v1445_v37 = vxor.u32 2147483648, %v2911_v46 }
 0x229   :  { %v1442_v16 = vxor.u32 2147483648, %v2913_v58  ;;  %v1534_v17 = vsel %vm1451_vm2, %v1533_v8, %v1532_v0 }
 0x22a   :  { %v1446_v59 = vsel %vm1444_vm5, %v1445_v37, %v2913_v58  ;;  %v2383_v25 = vsel %vm2381_vm7, %v1445_v37, %v2913_v58  ;;  %v1537_v7 = vsel %vm3917_vm4, %v3459_v26, %v1534_v17 }
 0x22b   :  { %v1443_v23 = vsel %vm1441_vm8, %v2911_v46, %v1442_v16  ;;  %v2380_v27 = vsel %vm2378_vm1, %v2911_v46, %v1442_v16  ;;  %2914 = vcosq.f32 %v1537_v7 }
 0x22c   :  { %v1447_v12 = vsel %vm1440_vm6, %v1443_v23, %v1446_v59  ;;  %v2384_v24 = vsel %vm2377_vm3, %v2380_v27, %v2383_v25  ;;  %2916 = vsinq.f32 %v1537_v7 }
 0x22d   :  { %v1448_v55 = vsel %vm1437_vm9, nan, %v1447_v12  ;;  %v2385_v19 = vsel %vm1437_vm9, nan, %v2384_v24 }
 0x22e   :  { %1560 = vst [vmem:[#allocation7 + $0x38] sm:$0xff] %v1448_v55  ;;  %2496 = vst [vmem:[#allocation8 + $0x38] sm:$0xff] %v2385_v19 }
 0x235   :  { %v2915_v38 = vpop.eup %2914 }
 0x236   :  { %v2917_v31 = vpop.eup %2916  ;;  %v1549_v62 = vxor.u32 2147483648, %v2915_v38 }
 0x237   :  { %v1546_v43 = vxor.u32 2147483648, %v2917_v31 }
 0x238   :  { %v1550_v29 = vsel %vm1548_vm10, %v1549_v62, %v2917_v31  ;;  %v2486_v39 = vsel %vm2484_vm11, %v1549_v62, %v2917_v31 }
 0x239   :  { %v1547_v35 = vsel %vm1545_vm12, %v2915_v38, %v1546_v43  ;;  %v2483_v44 = vsel %vm2481_vm13, %v2915_v38, %v1546_v43 }
 0x23a   :  { %v1551_v28 = vsel %vm1544_vm14, %v1547_v35, %v1550_v29  ;;  %v2487_v41 = vsel %vm2480_vm15, %v2483_v44, %v2486_v39 }
 0x23b   :  { %v1552_v48 = vsel %vm1541_vm0, nan, %v1551_v28  ;;  %v2488_v57 = vsel %vm1541_vm0, nan, %v2487_v41 }
 0x23c   :  { %1561 = vst [vmem:[#allocation7 + $0x40] sm:$0xff] %v1552_v48  ;;  %2497 = vst [vmem:[#allocation8 + $0x40] sm:$0xff] %v2488_v57 }
 0x23d   :  { %2973 = shalt.err (!%p2970_p6)
}
 0x23e   :  { %s2974_s16 = scalar_lea.hbm %s3959_s2, 1152 }
 0x23f   :  { %p2975_p7 = scmp.ne.s32.totalorder %s3959_s2, %s2974_s16  ;;  %p2978_p8 = scmp.lt.u32.totalorder %s2974_s16, %s3959_s2 }
 0x241   :  { %p2980_p9 = pnand %p2978_p8, %p2975_p7 }
 0x243   :  { %2983 = shalt.err (!%p2980_p9)
}
 0x244   :  { %2507 = dma.vmem_to_hbm [thread:$0]  %s2505_s10, 1152, %s3959_s2, [#allocation4]  }
 0x245   :  { %s2984_s23 = scalar_lea.vmem %s2515_s12, 1152  ;;  %p2989_p11 = scmp.lt.s32.totalorder %s2515_s12, %s2515_s12 }
 0x246   :  { %p2985_p10 = scmp.ne.s32.totalorder %s2515_s12, %s2984_s23  ;;  %p2990_p12 = scmp.lt.s32.totalorder %s2984_s23, %s2984_s23 }
 0x248   :  { %p2991_p13 = por %p2990_p12, %p2989_p11 }
 0x24a   :  { %p2992_p0 = pnand %p2991_p13, %p2985_p10 }
 0x24c   :  { %2995 = shalt.err (!%p2992_p0)
}
 0x24d   :  { %s2996_s26 = scalar_lea.hbm %s3960_s3, 1152 }
 0x24e   :  { %p2997_p1 = scmp.ne.s32.totalorder %s3960_s3, %s2996_s26  ;;  %p3000_p2 = scmp.lt.u32.totalorder %s2996_s26, %s3960_s3 }
 0x250   :  { %p3002_p3 = pnand %p3000_p2, %p2997_p1 }
 0x252   :  { %3005 = shalt.err (!%p3002_p3)
}
 0x253   :  { %2517 = dma.vmem_to_hbm [thread:$0]  %s2515_s12, 1152, %s3960_s3, [#allocation9]  }
 0x254   :  { %3010 = dma.done.wait [#allocation4], 1152  }
 0x255   :  { %3011 = vsyncadd [#allocation4], 4294966144 }
 0x256   :  { %3012 = dma.done.wait [#allocation9], 1152  }
 0x257   :  { %3013 = vsyncadd [#allocation9], 4294966144 }
 0x258   :  { %2524 = vsyncpa [#allocation3], 1 }
 0x259   :  { %2525 = vsyncpa [#allocation6], 1 }
 0x25a   :  { %2526 = vsyncpa [#allocation4], 1 }
 0x25b   :  { %2527 = vsyncpa [#allocation9], 1 }

</bundles_post_ra>
